<compile_context>
chip_gen: v7x
topology: tpu7x:2x2x1
jax: 0.10.0
libtpu: 0.0.40
codegen_flags: <defaults>
</compile_context>

<pallas_src>
import jax
import jax.numpy as jnp
import numpy as np
from jax import lax
from jax.experimental import pallas as pl
from jax.experimental.pallas import tpu as pltpu

LN_EPS = 1e-5


def _layer_norm(x, gamma, beta):
    mean = jnp.mean(x, axis=-1, keepdims=True)
    var = jnp.mean((x - mean) ** 2, axis=-1, keepdims=True)
    return (x - mean) * jax.lax.rsqrt(var + LN_EPS) * gamma + beta


# ----------------------------- fused Pallas kernel ---------------------------

def make_fused_kernel(num_layers, num_heads, d_qk, d_v, num_hidden,
                      use_proj_flags, leakiness):
    """Entire TransformerEncoderLayer forward: (MHA + FFN) x L + softplus."""
    Hq = num_heads * d_qk
    Hv = num_heads * d_v
    bf16 = jnp.bfloat16
    f32 = jnp.float32

    def kernel(*refs):
        x_ref = refs[0]
        win_refs = refs[1:1 + num_layers]          # per-layer packed QKV(+R) slabs
        wo_ref = refs[1 + num_layers]              # (L, H, d_v, nh) bf16
        ffn_ref = refs[2 + num_layers]             # (2L, nh, nh)    bf16
        vec_ref = refs[3 + num_layers]             # (R, nh)         f32
        o_ref = refs[-1]

        x = x_ref[...]                             # (N, d_in) f32
        V = vec_ref[...]                           # all biases / gamma / beta rows
        row = 0

        for l in range(num_layers):
            use_proj = use_proj_flags[l]

            # ---------------- MultiHeadAttention ----------------
            # One wide MXU contraction gives Q | K | V | (residual proj).
            # 1/T is already folded into the Q columns of the slab.
            win = win_refs[l][...]                                   # bf16 (d_in, K)
            y = jnp.dot(x.astype(bf16), win, preferred_element_type=f32)

            if use_proj:
                br = V[row:row + 1, :]; row += 1
                residual = y[:, 2 * Hq + Hv: 2 * Hq + Hv + num_hidden] + br
            else:
                residual = x

            # Head-batched (H, N, d) layout via leading-axis stacks of static
            # lane slices (no per-head compute passes below this point).
            qh = jnp.stack([y[:, h * d_qk:(h + 1) * d_qk]
                            for h in range(num_heads)], axis=0)       # (H, N, d_qk)
            kh = jnp.stack([y[:, Hq + h * d_qk: Hq + (h + 1) * d_qk]
                            for h in range(num_heads)], axis=0)       # (H, N, d_qk)
            vh = jnp.stack([y[:, 2 * Hq + h * d_v: 2 * Hq + (h + 1) * d_v]
                            for h in range(num_heads)], axis=0)       # (H, N, d_v)

            # Batched scores + softmax (one pass over (H, N, N)).
            s = jnp.einsum('hqd,hkd->hqk', qh.astype(bf16), kh.astype(bf16),
                           preferred_element_type=f32)                # (H, N, N)
            s = s - jnp.max(s, axis=-1, keepdims=True)
            e = jnp.exp(s)
            denom = jnp.sum(e, axis=-1, keepdims=True)
            attn = e * pl.reciprocal(denom, approx=True)

            ctx = jnp.einsum('hqk,hkd->hqd', attn.astype(bf16), vh.astype(bf16),
                             preferred_element_type=f32)              # (H, N, d_v)

            # Per-head output projection, summed over heads (no lane concat).
            oh = jnp.einsum('hnd,hdm->hnm', ctx.astype(bf16), wo_ref[l],
                            preferred_element_type=f32)               # (H, N, nh)
            out = jnp.sum(oh, axis=0) + residual
            # TODO(synk): nn.Dropout (train mode) not implemented — eval semantics.
            gamma = V[row:row + 1, :]
            beta = V[row + 1:row + 2, :]
            row += 2
            x = _layer_norm(out, gamma, beta)

            # ---------------- PositionWiseFFN ----------------
            b1 = V[row:row + 1, :]
            b2 = V[row + 1:row + 2, :]
            gamma_f = V[row + 2:row + 3, :]
            beta_f = V[row + 3:row + 4, :]
            row += 4

            hdn = jnp.dot(x.astype(bf16), ffn_ref[2 * l],
                          preferred_element_type=f32) + b1
            if leakiness == 0.0:
                hdn = jnp.maximum(hdn, 0.0)                 # 1 VPU op instead of 3
            else:
                hdn = jnp.where(hdn >= 0, hdn, leakiness * hdn)
            out = jnp.dot(hdn.astype(bf16), ffn_ref[2 * l + 1],
                          preferred_element_type=f32) + b2
            # TODO(synk): nn.Dropout (train mode) not implemented — eval semantics.
            out = out + x
            x = _layer_norm(out, gamma_f, beta_f)

        # ---------------- Softplus epilogue (fused, torch threshold=20) -------
        sp = jnp.log1p(jnp.exp(-jnp.abs(x))) + jnp.maximum(x, 0.0)
        o_ref[...] = jnp.where(x > 20.0, x, sp)

    return kernel


# ------------------------------- wrapper -------------------------------------

def transformer_forward(x, packed, num_heads, d_qk, d_v, num_hidden, leakiness):
    num_layers = len(packed["wins"])
    args = [x] + list(packed["wins"]) + [packed["wo"], packed["ffn"], packed["vec"]]

    kernel = make_fused_kernel(num_layers, num_heads, d_qk, d_v, num_hidden,
                               packed["use_proj"], leakiness)
    n = x.shape[0]
    vmem = pl.BlockSpec(memory_space=pltpu.MemorySpace.VMEM)
    return pl.pallas_call(
        kernel,
        out_shape=jax.ShapeDtypeStruct((n, num_hidden), jnp.float32),
        in_specs=[vmem] * len(args),
        out_specs=vmem,
    )(*args)


# --------------------------- parameter creation -------------------------------

def _uniform(key, shape, fan_in):
    bound = 1.0 / np.sqrt(fan_in)
    return jax.random.uniform(key, shape, jnp.float32, -bound, bound)


def init_transformer_params(key, num_input, num_hidden, d_qk, d_v, num_heads,
                            num_layers):
    """Returns (packed kernel-layout params, raw torch-layout params).

    Kernel layout decisions (all baked in at init, zero runtime cost):
      * heads made lane-contiguous / head-major (torch .view interleaves minor),
      * 1/T folded into the Q columns,
      * per-layer [Wq|Wk|Wv|(Wr)] packed into one (d_in, K) slab (bf16),
      * W_o stored as per-head slabs (H, d_v, nh) so contexts are summed,
        not lane-concatenated (bf16),
      * FFN weights stacked (2L, nh, nh) (bf16),
      * every bias / gamma / beta stacked into one (R, nh) f32 row slab.
    """
    temperature = float(num_hidden) ** 0.5      # T = num_output ** 0.5
    inv_T = 1.0 / temperature

    wins, wos, ffns, vec_rows, flags, raws = [], [], [], [], [], []
    d_in = num_input
    for _ in range(num_layers):
        key, *ks = jax.random.split(key, 12)
        # torch Linear weight layout: (out_features, in_features)
        Wq = _uniform(ks[0], (d_qk * num_heads, d_in), d_in)
        Wk = _uniform(ks[1], (d_qk * num_heads, d_in), d_in)
        Wv = _uniform(ks[2], (d_v * num_heads, d_in), d_in)
        Wo = _uniform(ks[3], (num_hidden, d_v * num_heads), d_v * num_heads)
        use_proj = (d_in != num_hidden)
        raw_mha = dict(Wq=Wq, Wk=Wk, Wv=Wv, Wo=Wo,
                       gamma=jnp.ones((num_hidden,), jnp.float32),
                       beta=jnp.zeros((num_hidden,), jnp.float32))

        def head_major_in(W, d, _d_in=d_in):
            # torch (d*H, d_in), row r = k*H + h  ->  kernel (d_in, H*d),
            # column c = h*d + k  (head-major, lane-contiguous per head)
            return (W.reshape(d, num_heads, _d_in)
                     .transpose(1, 0, 2)
                     .reshape(num_heads * d, _d_in).T)

        win_parts = [head_major_in(Wq, d_qk) * inv_T,     # 1/T folded into Q
                     head_major_in(Wk, d_qk),
                     head_major_in(Wv, d_v)]
        layer_rows = []
        if use_proj:
            Wr = _uniform(ks[4], (num_hidden, d_in), d_in)
            br = _uniform(ks[5], (num_hidden,), d_in)
            raw_mha.update(Wr=Wr, br=br)
            win_parts.append(Wr.T)
            layer_rows.append(br)
        wins.append(jnp.concatenate(win_parts, axis=1).astype(jnp.bfloat16))

        # Wo.T rows are j*H + h -> per-head slabs (H, d_v, nh) matching ctx[h]
        wo_k = Wo.T.reshape(d_v, num_heads, num_hidden).transpose(1, 0, 2)
        wos.append(wo_k.astype(jnp.bfloat16))
        layer_rows += [jnp.ones((num_hidden,), jnp.float32),    # gamma (MHA norm)
                       jnp.zeros((num_hidden,), jnp.float32)]   # beta  (MHA norm)

        W1 = _uniform(ks[6], (num_hidden, num_hidden), num_hidden)
        b1 = _uniform(ks[7], (num_hidden,), num_hidden)
        W2 = _uniform(ks[8], (num_hidden, num_hidden), num_hidden)
        b2 = _uniform(ks[9], (num_hidden,), num_hidden)
        raw_ffn = dict(W1=W1, b1=b1, W2=W2, b2=b2,
                       gamma=jnp.ones((num_hidden,), jnp.float32),
                       beta=jnp.zeros((num_hidden,), jnp.float32))
        ffns.append(jnp.stack([W1.T, W2.T], axis=0).astype(jnp.bfloat16))
        layer_rows += [b1, b2,
                       jnp.ones((num_hidden,), jnp.float32),    # gamma (FFN norm)
                       jnp.zeros((num_hidden,), jnp.float32)]   # beta  (FFN norm)

        vec_rows += layer_rows
        flags.append(use_proj)
        raws.append(dict(mha=raw_mha, ffn=raw_ffn, use_proj=use_proj))
        d_in = num_hidden

    packed = dict(
        wins=wins,                                  # L slabs, (d_in, K) bf16
        wo=jnp.stack(wos, axis=0),                  # (L, H, d_v, nh) bf16
        ffn=jnp.concatenate(ffns, axis=0),          # (2L, nh, nh)    bf16
        vec=jnp.stack(vec_rows, axis=0),            # (R, nh)         f32
        use_proj=tuple(flags),
    )
    return packed, raws


# ------------------------- pure-JAX reference (torch semantics) ---------------

def ref_forward(x, raws, num_heads, num_hidden, d_qk, d_v, leakiness):
    T = float(num_hidden) ** 0.5
    for raw in raws:
        m = raw["mha"]
        residual = x @ m["Wr"].T + m["br"] if raw["use_proj"] else x
        q = (x @ m["Wq"].T).reshape(-1, d_qk, num_heads)
        k = (x @ m["Wk"].T).reshape(-1, d_qk, num_heads)
        v = (x @ m["Wv"].T).reshape(-1, d_v, num_heads)
        a = jnp.einsum("ikb,jkb->ijb", q, k)
        attn = jax.nn.softmax(a / T, axis=1)
        v = jnp.einsum("bih,ijh->bjh", attn, v).reshape(-1, num_heads * d_v)
        out = v @ m["Wo"].T + residual
        x = _layer_norm(out, m["gamma"], m["beta"])

        f = raw["ffn"]
        h = x @ f["W1"].T + f["b1"]
        h = jnp.where(h >= 0, h, leakiness * h)
        out = h @ f["W2"].T + f["b2"] + x
        x = _layer_norm(out, f["gamma"], f["beta"])
    sp = jnp.log1p(jnp.exp(-jnp.abs(x))) + jnp.maximum(x, 0.0)
    return jnp.where(x > 20.0, x, sp)


if __name__ == "__main__":
    N, num_input, num_hidden = 16, 16, 32
    num_layers, d_qk, d_v, num_heads = 2, 16, 16, 4
    leakiness = 0.0

    key = jax.random.PRNGKey(0)
    key, xk, pk = jax.random.split(key, 3)
    x = jax.random.normal(xk, (N, num_input), jnp.float32)
    packed, raws = init_transformer_params(pk, num_input, num_hidden, d_qk, d_v,
                                           num_heads, num_layers)

    y = transformer_forward(x, packed, num_heads, d_qk, d_v, num_hidden, leakiness)
    y = jax.block_until_ready(y)

    y_ref = ref_forward(x, raws, num_heads, num_hidden, d_qk, d_v, leakiness)
    # Kernel feeds the MXU bf16 operands (f32 accumulation) and uses the EUP
    # approx reciprocal in softmax, per perf review; f32-torch parity ~3e-2.
    np.testing.assert_allclose(np.asarray(y), np.asarray(y_ref), rtol=3e-2, atol=3e-2)

    print("KERNEL_OK")
</pallas_src>

<mosaic_0001>
module attributes {stable_mosaic.version = 11 : i64} {
  func.func @kernel(%arg0: memref<16x16xf32, #tpu.memory_space<vmem>>, %arg1: memref<16x224xbf16, #tpu.memory_space<vmem>>, %arg2: memref<32x192xbf16, #tpu.memory_space<vmem>>, %arg3: memref<2x4x16x32xbf16, #tpu.memory_space<vmem>>, %arg4: memref<4x32x32xbf16, #tpu.memory_space<vmem>>, %arg5: memref<13x32xf32, #tpu.memory_space<vmem>>, %arg6: memref<16x32xf32, #tpu.memory_space<vmem>>) attributes {dimension_semantics = [], scalar_prefetch = 0 : i64, scratch_operands = 0 : i64, tpu.core_type = #tpu.core_type<tc>} {
    %c0 = arith.constant 0 : index
    %c0_0 = arith.constant 0 : index
    %0 = vector.load %arg0[%c0, %c0_0] : memref<16x16xf32, #tpu.memory_space<vmem>>, vector<16x16xf32>
    %c0_1 = arith.constant 0 : index
    %c0_2 = arith.constant 0 : index
    %1 = vector.load %arg5[%c0_1, %c0_2] : memref<13x32xf32, #tpu.memory_space<vmem>>, vector<13x32xf32>
    %c0_3 = arith.constant 0 : index
    %c0_4 = arith.constant 0 : index
    %2 = vector.load %arg1[%c0_3, %c0_4] : memref<16x224xbf16, #tpu.memory_space<vmem>>, vector<16x224xbf16>
    %3 = arith.truncf %0 : vector<16x16xf32> to vector<16x16xbf16>
    %cst = arith.constant dense<0.000000e+00> : vector<16x224xf32>
    %4 = tpu.matmul %3, %2, %cst {dimension_numbers = #tpu.dot_dimension_numbers<[1], [0], [0], [1], [0, 0, 1, 1], [], []>} : vector<16x16xbf16>, vector<16x224xbf16>, vector<16x224xf32> -> vector<16x224xf32>
    %5 = vector.extract_strided_slice %1 {offsets = [0, 0], sizes = [1, 32], strides = [1, 1]} : vector<13x32xf32> to vector<1x32xf32>
    %6 = vector.extract_strided_slice %4 {offsets = [0, 192], sizes = [16, 32], strides = [1, 1]} : vector<16x224xf32> to vector<16x32xf32>
    %7 = vector.broadcast %5 : vector<1x32xf32> to vector<16x32xf32>
    %8 = arith.addf %6, %7 : vector<16x32xf32>
    %9 = vector.extract_strided_slice %4 {offsets = [0, 0], sizes = [16, 16], strides = [1, 1]} : vector<16x224xf32> to vector<16x16xf32>
    %10 = vector.extract_strided_slice %4 {offsets = [0, 16], sizes = [16, 16], strides = [1, 1]} : vector<16x224xf32> to vector<16x16xf32>
    %11 = vector.extract_strided_slice %4 {offsets = [0, 32], sizes = [16, 16], strides = [1, 1]} : vector<16x224xf32> to vector<16x16xf32>
    %12 = vector.extract_strided_slice %4 {offsets = [0, 48], sizes = [16, 16], strides = [1, 1]} : vector<16x224xf32> to vector<16x16xf32>
    %13 = vector.shape_cast %9 : vector<16x16xf32> to vector<1x16x16xf32>
    %14 = vector.shape_cast %10 : vector<16x16xf32> to vector<1x16x16xf32>
    %15 = vector.shape_cast %11 : vector<16x16xf32> to vector<1x16x16xf32>
    %16 = vector.shape_cast %12 : vector<16x16xf32> to vector<1x16x16xf32>
    %17 = tpu.concatenate %13, %14, %15, %16 in 0 : vector<1x16x16xf32>, vector<1x16x16xf32>, vector<1x16x16xf32>, vector<1x16x16xf32> -> vector<4x16x16xf32>
    %18 = vector.extract_strided_slice %4 {offsets = [0, 64], sizes = [16, 16], strides = [1, 1]} : vector<16x224xf32> to vector<16x16xf32>
    %19 = vector.extract_strided_slice %4 {offsets = [0, 80], sizes = [16, 16], strides = [1, 1]} : vector<16x224xf32> to vector<16x16xf32>
    %20 = vector.extract_strided_slice %4 {offsets = [0, 96], sizes = [16, 16], strides = [1, 1]} : vector<16x224xf32> to vector<16x16xf32>
    %21 = vector.extract_strided_slice %4 {offsets = [0, 112], sizes = [16, 16], strides = [1, 1]} : vector<16x224xf32> to vector<16x16xf32>
    %22 = vector.shape_cast %18 : vector<16x16xf32> to vector<1x16x16xf32>
    %23 = vector.shape_cast %19 : vector<16x16xf32> to vector<1x16x16xf32>
    %24 = vector.shape_cast %20 : vector<16x16xf32> to vector<1x16x16xf32>
    %25 = vector.shape_cast %21 : vector<16x16xf32> to vector<1x16x16xf32>
    %26 = tpu.concatenate %22, %23, %24, %25 in 0 : vector<1x16x16xf32>, vector<1x16x16xf32>, vector<1x16x16xf32>, vector<1x16x16xf32> -> vector<4x16x16xf32>
    %27 = vector.extract_strided_slice %4 {offsets = [0, 128], sizes = [16, 16], strides = [1, 1]} : vector<16x224xf32> to vector<16x16xf32>
    %28 = vector.extract_strided_slice %4 {offsets = [0, 144], sizes = [16, 16], strides = [1, 1]} : vector<16x224xf32> to vector<16x16xf32>
    %29 = vector.extract_strided_slice %4 {offsets = [0, 160], sizes = [16, 16], strides = [1, 1]} : vector<16x224xf32> to vector<16x16xf32>
    %30 = vector.extract_strided_slice %4 {offsets = [0, 176], sizes = [16, 16], strides = [1, 1]} : vector<16x224xf32> to vector<16x16xf32>
    %31 = vector.shape_cast %27 : vector<16x16xf32> to vector<1x16x16xf32>
    %32 = vector.shape_cast %28 : vector<16x16xf32> to vector<1x16x16xf32>
    %33 = vector.shape_cast %29 : vector<16x16xf32> to vector<1x16x16xf32>
    %34 = vector.shape_cast %30 : vector<16x16xf32> to vector<1x16x16xf32>
    %35 = tpu.concatenate %31, %32, %33, %34 in 0 : vector<1x16x16xf32>, vector<1x16x16xf32>, vector<1x16x16xf32>, vector<1x16x16xf32> -> vector<4x16x16xf32>
    %36 = arith.truncf %17 : vector<4x16x16xf32> to vector<4x16x16xbf16>
    %37 = arith.truncf %26 : vector<4x16x16xf32> to vector<4x16x16xbf16>
    "tpu.trace_start"() <{level = 10 : i32, message = "hqd,hkd->hqk"}> : () -> ()
    %cst_5 = arith.constant dense<0.000000e+00> : vector<4x16x16xf32>
    %38 = tpu.matmul %36, %37, %cst_5 {dimension_numbers = #tpu.dot_dimension_numbers<[2], [2], [1], [1], [0, 0, 0, 1, 1, 1], [0], [0]>} : vector<4x16x16xbf16>, vector<4x16x16xbf16>, vector<4x16x16xf32> -> vector<4x16x16xf32>
    "tpu.trace_stop"() : () -> ()
    %cst_6 = arith.constant dense<0xFF800000> : vector<4x16xf32>
    %39 = vector.multi_reduction <maximumf>, %38, %cst_6 [2] : vector<4x16x16xf32> to vector<4x16xf32>
    %40 = vector.shape_cast %39 : vector<4x16xf32> to vector<4x16x1xf32>
    %41 = vector.broadcast %40 : vector<4x16x1xf32> to vector<4x16x16xf32>
    %42 = arith.subf %38, %41 : vector<4x16x16xf32>
    %43 = math.exp %42 : vector<4x16x16xf32>
    %cst_7 = arith.constant dense<0.000000e+00> : vector<4x16xf32>
    %44 = vector.multi_reduction <add>, %43, %cst_7 [2] : vector<4x16x16xf32> to vector<4x16xf32>
    %45 = vector.shape_cast %44 : vector<4x16xf32> to vector<4x16x1xf32>
    %46 = tpu.reciprocal %45 {approx = true} : vector<4x16x1xf32> -> vector<4x16x1xf32>
    %47 = vector.broadcast %46 : vector<4x16x1xf32> to vector<4x16x16xf32>
    %48 = arith.mulf %43, %47 : vector<4x16x16xf32>
    %49 = arith.truncf %48 : vector<4x16x16xf32> to vector<4x16x16xbf16>
    %50 = arith.truncf %35 : vector<4x16x16xf32> to vector<4x16x16xbf16>
    "tpu.trace_start"() <{level = 10 : i32, message = "hqk,hkd->hqd"}> : () -> ()
    %cst_8 = arith.constant dense<0.000000e+00> : vector<4x16x16xf32>
    %51 = tpu.matmul %49, %50, %cst_8 {dimension_numbers = #tpu.dot_dimension_numbers<[2], [1], [1], [2], [0, 0, 0, 1, 1, 2], [0], [0]>} : vector<4x16x16xbf16>, vector<4x16x16xbf16>, vector<4x16x16xf32> -> vector<4x16x16xf32>
    "tpu.trace_stop"() : () -> ()
    %52 = arith.truncf %51 : vector<4x16x16xf32> to vector<4x16x16xbf16>
    %c0_9 = arith.constant 0 : index
    %c0_10 = arith.constant 0 : index
    %c0_11 = arith.constant 0 : index
    %c0_12 = arith.constant 0 : index
    %53 = vector.load %arg3[%c0_9, %c0_10, %c0_11, %c0_12] : memref<2x4x16x32xbf16, #tpu.memory_space<vmem>>, vector<1x4x16x32xbf16>
    %54 = vector.shape_cast %53 : vector<1x4x16x32xbf16> to vector<4x16x32xbf16>
    "tpu.trace_start"() <{level = 10 : i32, message = "hnd,hdm->hnm"}> : () -> ()
    %cst_13 = arith.constant dense<0.000000e+00> : vector<4x16x32xf32>
    %55 = tpu.matmul %52, %54, %cst_13 {dimension_numbers = #tpu.dot_dimension_numbers<[2], [1], [1], [2], [0, 0, 0, 1, 1, 2], [0], [0]>} : vector<4x16x16xbf16>, vector<4x16x32xbf16>, vector<4x16x32xf32> -> vector<4x16x32xf32>
    "tpu.trace_stop"() : () -> ()
    %cst_14 = arith.constant dense<0.000000e+00> : vector<16x32xf32>
    %56 = vector.multi_reduction <add>, %55, %cst_14 [0] : vector<4x16x32xf32> to vector<16x32xf32>
    %57 = arith.addf %56, %8 : vector<16x32xf32>
    %58 = vector.extract_strided_slice %1 {offsets = [1, 0], sizes = [1, 32], strides = [1, 1]} : vector<13x32xf32> to vector<1x32xf32>
    %59 = vector.extract_strided_slice %1 {offsets = [2, 0], sizes = [1, 32], strides = [1, 1]} : vector<13x32xf32> to vector<1x32xf32>
    %cst_15 = arith.constant dense<0.000000e+00> : vector<16xf32>
    %60 = vector.multi_reduction <add>, %57, %cst_15 [1] : vector<16x32xf32> to vector<16xf32>
    %61 = vector.shape_cast %60 : vector<16xf32> to vector<16x1xf32>
    %cst_16 = arith.constant 3.200000e+01 : f32
    %62 = vector.broadcast %cst_16 : f32 to vector<16x1xf32>
    %63 = arith.divf %61, %62 : vector<16x1xf32>
    %64 = vector.broadcast %63 : vector<16x1xf32> to vector<16x32xf32>
    %65 = arith.subf %57, %64 : vector<16x32xf32>
    %66 = arith.mulf %65, %65 : vector<16x32xf32>
    %cst_17 = arith.constant dense<0.000000e+00> : vector<16xf32>
    %67 = vector.multi_reduction <add>, %66, %cst_17 [1] : vector<16x32xf32> to vector<16xf32>
    %68 = vector.shape_cast %67 : vector<16xf32> to vector<16x1xf32>
    %cst_18 = arith.constant 3.200000e+01 : f32
    %69 = vector.broadcast %cst_18 : f32 to vector<16x1xf32>
    %70 = arith.divf %68, %69 : vector<16x1xf32>
    %71 = vector.broadcast %63 : vector<16x1xf32> to vector<16x32xf32>
    %72 = arith.subf %57, %71 : vector<16x32xf32>
    %cst_19 = arith.constant 9.99999974E-6 : f32
    %73 = vector.broadcast %cst_19 : f32 to vector<16x1xf32>
    %74 = arith.addf %70, %73 : vector<16x1xf32>
    %75 = math.rsqrt %74 : vector<16x1xf32>
    %76 = vector.broadcast %75 : vector<16x1xf32> to vector<16x32xf32>
    %77 = arith.mulf %72, %76 : vector<16x32xf32>
    %78 = vector.broadcast %58 : vector<1x32xf32> to vector<16x32xf32>
    %79 = arith.mulf %77, %78 : vector<16x32xf32>
    %80 = vector.broadcast %59 : vector<1x32xf32> to vector<16x32xf32>
    %81 = arith.addf %79, %80 : vector<16x32xf32>
    %82 = vector.extract_strided_slice %1 {offsets = [3, 0], sizes = [1, 32], strides = [1, 1]} : vector<13x32xf32> to vector<1x32xf32>
    %83 = vector.extract_strided_slice %1 {offsets = [4, 0], sizes = [1, 32], strides = [1, 1]} : vector<13x32xf32> to vector<1x32xf32>
    %84 = vector.extract_strided_slice %1 {offsets = [5, 0], sizes = [1, 32], strides = [1, 1]} : vector<13x32xf32> to vector<1x32xf32>
    %85 = vector.extract_strided_slice %1 {offsets = [6, 0], sizes = [1, 32], strides = [1, 1]} : vector<13x32xf32> to vector<1x32xf32>
    %86 = arith.truncf %81 : vector<16x32xf32> to vector<16x32xbf16>
    %c0_20 = arith.constant 0 : index
    %c0_21 = arith.constant 0 : index
    %c0_22 = arith.constant 0 : index
    %87 = vector.load %arg4[%c0_20, %c0_21, %c0_22] : memref<4x32x32xbf16, #tpu.memory_space<vmem>>, vector<1x32x32xbf16>
    %88 = vector.shape_cast %87 : vector<1x32x32xbf16> to vector<32x32xbf16>
    %cst_23 = arith.constant dense<0.000000e+00> : vector<16x32xf32>
    %89 = tpu.matmul %86, %88, %cst_23 {dimension_numbers = #tpu.dot_dimension_numbers<[1], [0], [0], [1], [0, 0, 1, 1], [], []>} : vector<16x32xbf16>, vector<32x32xbf16>, vector<16x32xf32> -> vector<16x32xf32>
    %90 = vector.broadcast %82 : vector<1x32xf32> to vector<16x32xf32>
    %91 = arith.addf %89, %90 : vector<16x32xf32>
    %cst_24 = arith.constant 0.000000e+00 : f32
    %92 = vector.broadcast %cst_24 : f32 to vector<16x32xf32>
    %93 = arith.maximumf %91, %92 : vector<16x32xf32>
    %94 = arith.truncf %93 : vector<16x32xf32> to vector<16x32xbf16>
    %c1 = arith.constant 1 : index
    %c0_25 = arith.constant 0 : index
    %c0_26 = arith.constant 0 : index
    %95 = vector.load %arg4[%c1, %c0_25, %c0_26] : memref<4x32x32xbf16, #tpu.memory_space<vmem>>, vector<1x32x32xbf16>
    %96 = vector.shape_cast %95 : vector<1x32x32xbf16> to vector<32x32xbf16>
    %cst_27 = arith.constant dense<0.000000e+00> : vector<16x32xf32>
    %97 = tpu.matmul %94, %96, %cst_27 {dimension_numbers = #tpu.dot_dimension_numbers<[1], [0], [0], [1], [0, 0, 1, 1], [], []>} : vector<16x32xbf16>, vector<32x32xbf16>, vector<16x32xf32> -> vector<16x32xf32>
    %98 = vector.broadcast %83 : vector<1x32xf32> to vector<16x32xf32>
    %99 = arith.addf %97, %98 : vector<16x32xf32>
    %100 = arith.addf %99, %81 : vector<16x32xf32>
    %cst_28 = arith.constant dense<0.000000e+00> : vector<16xf32>
    %101 = vector.multi_reduction <add>, %100, %cst_28 [1] : vector<16x32xf32> to vector<16xf32>
    %102 = vector.shape_cast %101 : vector<16xf32> to vector<16x1xf32>
    %cst_29 = arith.constant 3.200000e+01 : f32
    %103 = vector.broadcast %cst_29 : f32 to vector<16x1xf32>
    %104 = arith.divf %102, %103 : vector<16x1xf32>
    %105 = vector.broadcast %104 : vector<16x1xf32> to vector<16x32xf32>
    %106 = arith.subf %100, %105 : vector<16x32xf32>
    %107 = arith.mulf %106, %106 : vector<16x32xf32>
    %cst_30 = arith.constant dense<0.000000e+00> : vector<16xf32>
    %108 = vector.multi_reduction <add>, %107, %cst_30 [1] : vector<16x32xf32> to vector<16xf32>
    %109 = vector.shape_cast %108 : vector<16xf32> to vector<16x1xf32>
    %cst_31 = arith.constant 3.200000e+01 : f32
    %110 = vector.broadcast %cst_31 : f32 to vector<16x1xf32>
    %111 = arith.divf %109, %110 : vector<16x1xf32>
    %112 = vector.broadcast %104 : vector<16x1xf32> to vector<16x32xf32>
    %113 = arith.subf %100, %112 : vector<16x32xf32>
    %cst_32 = arith.constant 9.99999974E-6 : f32
    %114 = vector.broadcast %cst_32 : f32 to vector<16x1xf32>
    %115 = arith.addf %111, %114 : vector<16x1xf32>
    %116 = math.rsqrt %115 : vector<16x1xf32>
    %117 = vector.broadcast %116 : vector<16x1xf32> to vector<16x32xf32>
    %118 = arith.mulf %113, %117 : vector<16x32xf32>
    %119 = vector.broadcast %84 : vector<1x32xf32> to vector<16x32xf32>
    %120 = arith.mulf %118, %119 : vector<16x32xf32>
    %121 = vector.broadcast %85 : vector<1x32xf32> to vector<16x32xf32>
    %122 = arith.addf %120, %121 : vector<16x32xf32>
    %c0_33 = arith.constant 0 : index
    %c0_34 = arith.constant 0 : index
    %123 = vector.load %arg2[%c0_33, %c0_34] : memref<32x192xbf16, #tpu.memory_space<vmem>>, vector<32x192xbf16>
    %124 = arith.truncf %122 : vector<16x32xf32> to vector<16x32xbf16>
    %cst_35 = arith.constant dense<0.000000e+00> : vector<16x192xf32>
    %125 = tpu.matmul %124, %123, %cst_35 {dimension_numbers = #tpu.dot_dimension_numbers<[1], [0], [0], [1], [0, 0, 1, 1], [], []>} : vector<16x32xbf16>, vector<32x192xbf16>, vector<16x192xf32> -> vector<16x192xf32>
    %126 = vector.extract_strided_slice %125 {offsets = [0, 0], sizes = [16, 16], strides = [1, 1]} : vector<16x192xf32> to vector<16x16xf32>
    %127 = vector.extract_strided_slice %125 {offsets = [0, 16], sizes = [16, 16], strides = [1, 1]} : vector<16x192xf32> to vector<16x16xf32>
    %128 = vector.extract_strided_slice %125 {offsets = [0, 32], sizes = [16, 16], strides = [1, 1]} : vector<16x192xf32> to vector<16x16xf32>
    %129 = vector.extract_strided_slice %125 {offsets = [0, 48], sizes = [16, 16], strides = [1, 1]} : vector<16x192xf32> to vector<16x16xf32>
    %130 = vector.shape_cast %126 : vector<16x16xf32> to vector<1x16x16xf32>
    %131 = vector.shape_cast %127 : vector<16x16xf32> to vector<1x16x16xf32>
    %132 = vector.shape_cast %128 : vector<16x16xf32> to vector<1x16x16xf32>
    %133 = vector.shape_cast %129 : vector<16x16xf32> to vector<1x16x16xf32>
    %134 = tpu.concatenate %130, %131, %132, %133 in 0 : vector<1x16x16xf32>, vector<1x16x16xf32>, vector<1x16x16xf32>, vector<1x16x16xf32> -> vector<4x16x16xf32>
    %135 = vector.extract_strided_slice %125 {offsets = [0, 64], sizes = [16, 16], strides = [1, 1]} : vector<16x192xf32> to vector<16x16xf32>
    %136 = vector.extract_strided_slice %125 {offsets = [0, 80], sizes = [16, 16], strides = [1, 1]} : vector<16x192xf32> to vector<16x16xf32>
    %137 = vector.extract_strided_slice %125 {offsets = [0, 96], sizes = [16, 16], strides = [1, 1]} : vector<16x192xf32> to vector<16x16xf32>
    %138 = vector.extract_strided_slice %125 {offsets = [0, 112], sizes = [16, 16], strides = [1, 1]} : vector<16x192xf32> to vector<16x16xf32>
    %139 = vector.shape_cast %135 : vector<16x16xf32> to vector<1x16x16xf32>
    %140 = vector.shape_cast %136 : vector<16x16xf32> to vector<1x16x16xf32>
    %141 = vector.shape_cast %137 : vector<16x16xf32> to vector<1x16x16xf32>
    %142 = vector.shape_cast %138 : vector<16x16xf32> to vector<1x16x16xf32>
    %143 = tpu.concatenate %139, %140, %141, %142 in 0 : vector<1x16x16xf32>, vector<1x16x16xf32>, vector<1x16x16xf32>, vector<1x16x16xf32> -> vector<4x16x16xf32>
    %144 = vector.extract_strided_slice %125 {offsets = [0, 128], sizes = [16, 16], strides = [1, 1]} : vector<16x192xf32> to vector<16x16xf32>
    %145 = vector.extract_strided_slice %125 {offsets = [0, 144], sizes = [16, 16], strides = [1, 1]} : vector<16x192xf32> to vector<16x16xf32>
    %146 = vector.extract_strided_slice %125 {offsets = [0, 160], sizes = [16, 16], strides = [1, 1]} : vector<16x192xf32> to vector<16x16xf32>
    %147 = vector.extract_strided_slice %125 {offsets = [0, 176], sizes = [16, 16], strides = [1, 1]} : vector<16x192xf32> to vector<16x16xf32>
    %148 = vector.shape_cast %144 : vector<16x16xf32> to vector<1x16x16xf32>
    %149 = vector.shape_cast %145 : vector<16x16xf32> to vector<1x16x16xf32>
    %150 = vector.shape_cast %146 : vector<16x16xf32> to vector<1x16x16xf32>
    %151 = vector.shape_cast %147 : vector<16x16xf32> to vector<1x16x16xf32>
    %152 = tpu.concatenate %148, %149, %150, %151 in 0 : vector<1x16x16xf32>, vector<1x16x16xf32>, vector<1x16x16xf32>, vector<1x16x16xf32> -> vector<4x16x16xf32>
    %153 = arith.truncf %134 : vector<4x16x16xf32> to vector<4x16x16xbf16>
    %154 = arith.truncf %143 : vector<4x16x16xf32> to vector<4x16x16xbf16>
    "tpu.trace_start"() <{level = 10 : i32, message = "hqd,hkd->hqk"}> : () -> ()
    %cst_36 = arith.constant dense<0.000000e+00> : vector<4x16x16xf32>
    %155 = tpu.matmul %153, %154, %cst_36 {dimension_numbers = #tpu.dot_dimension_numbers<[2], [2], [1], [1], [0, 0, 0, 1, 1, 1], [0], [0]>} : vector<4x16x16xbf16>, vector<4x16x16xbf16>, vector<4x16x16xf32> -> vector<4x16x16xf32>
    "tpu.trace_stop"() : () -> ()
    %cst_37 = arith.constant dense<0xFF800000> : vector<4x16xf32>
    %156 = vector.multi_reduction <maximumf>, %155, %cst_37 [2] : vector<4x16x16xf32> to vector<4x16xf32>
    %157 = vector.shape_cast %156 : vector<4x16xf32> to vector<4x16x1xf32>
    %158 = vector.broadcast %157 : vector<4x16x1xf32> to vector<4x16x16xf32>
    %159 = arith.subf %155, %158 : vector<4x16x16xf32>
    %160 = math.exp %159 : vector<4x16x16xf32>
    %cst_38 = arith.constant dense<0.000000e+00> : vector<4x16xf32>
    %161 = vector.multi_reduction <add>, %160, %cst_38 [2] : vector<4x16x16xf32> to vector<4x16xf32>
    %162 = vector.shape_cast %161 : vector<4x16xf32> to vector<4x16x1xf32>
    %163 = tpu.reciprocal %162 {approx = true} : vector<4x16x1xf32> -> vector<4x16x1xf32>
    %164 = vector.broadcast %163 : vector<4x16x1xf32> to vector<4x16x16xf32>
    %165 = arith.mulf %160, %164 : vector<4x16x16xf32>
    %166 = arith.truncf %165 : vector<4x16x16xf32> to vector<4x16x16xbf16>
    %167 = arith.truncf %152 : vector<4x16x16xf32> to vector<4x16x16xbf16>
    "tpu.trace_start"() <{level = 10 : i32, message = "hqk,hkd->hqd"}> : () -> ()
    %cst_39 = arith.constant dense<0.000000e+00> : vector<4x16x16xf32>
    %168 = tpu.matmul %166, %167, %cst_39 {dimension_numbers = #tpu.dot_dimension_numbers<[2], [1], [1], [2], [0, 0, 0, 1, 1, 2], [0], [0]>} : vector<4x16x16xbf16>, vector<4x16x16xbf16>, vector<4x16x16xf32> -> vector<4x16x16xf32>
    "tpu.trace_stop"() : () -> ()
    %169 = arith.truncf %168 : vector<4x16x16xf32> to vector<4x16x16xbf16>
    %c1_40 = arith.constant 1 : index
    %c0_41 = arith.constant 0 : index
    %c0_42 = arith.constant 0 : index
    %c0_43 = arith.constant 0 : index
    %170 = vector.load %arg3[%c1_40, %c0_41, %c0_42, %c0_43] : memref<2x4x16x32xbf16, #tpu.memory_space<vmem>>, vector<1x4x16x32xbf16>
    %171 = vector.shape_cast %170 : vector<1x4x16x32xbf16> to vector<4x16x32xbf16>
    "tpu.trace_start"() <{level = 10 : i32, message = "hnd,hdm->hnm"}> : () -> ()
    %cst_44 = arith.constant dense<0.000000e+00> : vector<4x16x32xf32>
    %172 = tpu.matmul %169, %171, %cst_44 {dimension_numbers = #tpu.dot_dimension_numbers<[2], [1], [1], [2], [0, 0, 0, 1, 1, 2], [0], [0]>} : vector<4x16x16xbf16>, vector<4x16x32xbf16>, vector<4x16x32xf32> -> vector<4x16x32xf32>
    "tpu.trace_stop"() : () -> ()
    %cst_45 = arith.constant dense<0.000000e+00> : vector<16x32xf32>
    %173 = vector.multi_reduction <add>, %172, %cst_45 [0] : vector<4x16x32xf32> to vector<16x32xf32>
    %174 = arith.addf %173, %122 : vector<16x32xf32>
    %175 = vector.extract_strided_slice %1 {offsets = [7, 0], sizes = [1, 32], strides = [1, 1]} : vector<13x32xf32> to vector<1x32xf32>
    %176 = vector.extract_strided_slice %1 {offsets = [8, 0], sizes = [1, 32], strides = [1, 1]} : vector<13x32xf32> to vector<1x32xf32>
    %cst_46 = arith.constant dense<0.000000e+00> : vector<16xf32>
    %177 = vector.multi_reduction <add>, %174, %cst_46 [1] : vector<16x32xf32> to vector<16xf32>
    %178 = vector.shape_cast %177 : vector<16xf32> to vector<16x1xf32>
    %cst_47 = arith.constant 3.200000e+01 : f32
    %179 = vector.broadcast %cst_47 : f32 to vector<16x1xf32>
    %180 = arith.divf %178, %179 : vector<16x1xf32>
    %181 = vector.broadcast %180 : vector<16x1xf32> to vector<16x32xf32>
    %182 = arith.subf %174, %181 : vector<16x32xf32>
    %183 = arith.mulf %182, %182 : vector<16x32xf32>
    %cst_48 = arith.constant dense<0.000000e+00> : vector<16xf32>
    %184 = vector.multi_reduction <add>, %183, %cst_48 [1] : vector<16x32xf32> to vector<16xf32>
    %185 = vector.shape_cast %184 : vector<16xf32> to vector<16x1xf32>
    %cst_49 = arith.constant 3.200000e+01 : f32
    %186 = vector.broadcast %cst_49 : f32 to vector<16x1xf32>
    %187 = arith.divf %185, %186 : vector<16x1xf32>
    %188 = vector.broadcast %180 : vector<16x1xf32> to vector<16x32xf32>
    %189 = arith.subf %174, %188 : vector<16x32xf32>
    %cst_50 = arith.constant 9.99999974E-6 : f32
    %190 = vector.broadcast %cst_50 : f32 to vector<16x1xf32>
    %191 = arith.addf %187, %190 : vector<16x1xf32>
    %192 = math.rsqrt %191 : vector<16x1xf32>
    %193 = vector.broadcast %192 : vector<16x1xf32> to vector<16x32xf32>
    %194 = arith.mulf %189, %193 : vector<16x32xf32>
    %195 = vector.broadcast %175 : vector<1x32xf32> to vector<16x32xf32>
    %196 = arith.mulf %194, %195 : vector<16x32xf32>
    %197 = vector.broadcast %176 : vector<1x32xf32> to vector<16x32xf32>
    %198 = arith.addf %196, %197 : vector<16x32xf32>
    %199 = vector.extract_strided_slice %1 {offsets = [9, 0], sizes = [1, 32], strides = [1, 1]} : vector<13x32xf32> to vector<1x32xf32>
    %200 = vector.extract_strided_slice %1 {offsets = [10, 0], sizes = [1, 32], strides = [1, 1]} : vector<13x32xf32> to vector<1x32xf32>
    %201 = vector.extract_strided_slice %1 {offsets = [11, 0], sizes = [1, 32], strides = [1, 1]} : vector<13x32xf32> to vector<1x32xf32>
    %202 = vector.extract_strided_slice %1 {offsets = [12, 0], sizes = [1, 32], strides = [1, 1]} : vector<13x32xf32> to vector<1x32xf32>
    %203 = arith.truncf %198 : vector<16x32xf32> to vector<16x32xbf16>
    %c2 = arith.constant 2 : index
    %c0_51 = arith.constant 0 : index
    %c0_52 = arith.constant 0 : index
    %204 = vector.load %arg4[%c2, %c0_51, %c0_52] : memref<4x32x32xbf16, #tpu.memory_space<vmem>>, vector<1x32x32xbf16>
    %205 = vector.shape_cast %204 : vector<1x32x32xbf16> to vector<32x32xbf16>
    %cst_53 = arith.constant dense<0.000000e+00> : vector<16x32xf32>
    %206 = tpu.matmul %203, %205, %cst_53 {dimension_numbers = #tpu.dot_dimension_numbers<[1], [0], [0], [1], [0, 0, 1, 1], [], []>} : vector<16x32xbf16>, vector<32x32xbf16>, vector<16x32xf32> -> vector<16x32xf32>
    %207 = vector.broadcast %199 : vector<1x32xf32> to vector<16x32xf32>
    %208 = arith.addf %206, %207 : vector<16x32xf32>
    %cst_54 = arith.constant 0.000000e+00 : f32
    %209 = vector.broadcast %cst_54 : f32 to vector<16x32xf32>
    %210 = arith.maximumf %208, %209 : vector<16x32xf32>
    %211 = arith.truncf %210 : vector<16x32xf32> to vector<16x32xbf16>
    %c3 = arith.constant 3 : index
    %c0_55 = arith.constant 0 : index
    %c0_56 = arith.constant 0 : index
    %212 = vector.load %arg4[%c3, %c0_55, %c0_56] : memref<4x32x32xbf16, #tpu.memory_space<vmem>>, vector<1x32x32xbf16>
    %213 = vector.shape_cast %212 : vector<1x32x32xbf16> to vector<32x32xbf16>
    %cst_57 = arith.constant dense<0.000000e+00> : vector<16x32xf32>
    %214 = tpu.matmul %211, %213, %cst_57 {dimension_numbers = #tpu.dot_dimension_numbers<[1], [0], [0], [1], [0, 0, 1, 1], [], []>} : vector<16x32xbf16>, vector<32x32xbf16>, vector<16x32xf32> -> vector<16x32xf32>
    %215 = vector.broadcast %200 : vector<1x32xf32> to vector<16x32xf32>
    %216 = arith.addf %214, %215 : vector<16x32xf32>
    %217 = arith.addf %216, %198 : vector<16x32xf32>
    %cst_58 = arith.constant dense<0.000000e+00> : vector<16xf32>
    %218 = vector.multi_reduction <add>, %217, %cst_58 [1] : vector<16x32xf32> to vector<16xf32>
    %219 = vector.shape_cast %218 : vector<16xf32> to vector<16x1xf32>
    %cst_59 = arith.constant 3.200000e+01 : f32
    %220 = vector.broadcast %cst_59 : f32 to vector<16x1xf32>
    %221 = arith.divf %219, %220 : vector<16x1xf32>
    %222 = vector.broadcast %221 : vector<16x1xf32> to vector<16x32xf32>
    %223 = arith.subf %217, %222 : vector<16x32xf32>
    %224 = arith.mulf %223, %223 : vector<16x32xf32>
    %cst_60 = arith.constant dense<0.000000e+00> : vector<16xf32>
    %225 = vector.multi_reduction <add>, %224, %cst_60 [1] : vector<16x32xf32> to vector<16xf32>
    %226 = vector.shape_cast %225 : vector<16xf32> to vector<16x1xf32>
    %cst_61 = arith.constant 3.200000e+01 : f32
    %227 = vector.broadcast %cst_61 : f32 to vector<16x1xf32>
    %228 = arith.divf %226, %227 : vector<16x1xf32>
    %229 = vector.broadcast %221 : vector<16x1xf32> to vector<16x32xf32>
    %230 = arith.subf %217, %229 : vector<16x32xf32>
    %cst_62 = arith.constant 9.99999974E-6 : f32
    %231 = vector.broadcast %cst_62 : f32 to vector<16x1xf32>
    %232 = arith.addf %228, %231 : vector<16x1xf32>
    %233 = math.rsqrt %232 : vector<16x1xf32>
    %234 = vector.broadcast %233 : vector<16x1xf32> to vector<16x32xf32>
    %235 = arith.mulf %230, %234 : vector<16x32xf32>
    %236 = vector.broadcast %201 : vector<1x32xf32> to vector<16x32xf32>
    %237 = arith.mulf %235, %236 : vector<16x32xf32>
    %238 = vector.broadcast %202 : vector<1x32xf32> to vector<16x32xf32>
    %239 = arith.addf %237, %238 : vector<16x32xf32>
    %240 = math.absf %239 : vector<16x32xf32>
    %cst_63 = arith.constant 0.000000e+00 : f32
    %241 = vector.broadcast %cst_63 : f32 to vector<16x32xf32>
    %242 = arith.subf %241, %240 : vector<16x32xf32>
    %243 = math.exp %242 : vector<16x32xf32>
    %244 = math.log1p %243 : vector<16x32xf32>
    %cst_64 = arith.constant 0.000000e+00 : f32
    %245 = vector.broadcast %cst_64 : f32 to vector<16x32xf32>
    %246 = arith.maximumf %239, %245 : vector<16x32xf32>
    %247 = arith.addf %244, %246 : vector<16x32xf32>
    %cst_65 = arith.constant 2.000000e+01 : f32
    %248 = vector.broadcast %cst_65 : f32 to vector<16x32xf32>
    %249 = arith.cmpf ogt, %239, %248 : vector<16x32xf32>
    %250 = arith.select %249, %239, %247 : vector<16x32xi1>, vector<16x32xf32>
    %c0_66 = arith.constant 0 : index
    %c0_67 = arith.constant 0 : index
    %251 = vector.load %arg6[%c0_66, %c0_67] : memref<16x32xf32, #tpu.memory_space<vmem>>, vector<16x32xf32>
    tpu.vector_store %arg6[%c0_66, %c0_67], %250 {strides = array<i32>} : memref<16x32xf32, #tpu.memory_space<vmem>>, vector<16x32xf32>,
    return
  }
}

</mosaic_0001>

<bundles_post_ra>
// kernel: tpu_custom_call.1
= control target key start
LH: loop header
LB: loop body
LE: loop exit
PB: predicated region body
PF: predicated region fallthrough
CT: control target
= control target key end

     0   :  { %11 = vsyncpa [#allocation3], 0  ;;  %s3305_s0 = inlined_call_operand.hbm [shape: f32[16,16], index: 0, kind: input, shape index: {}]   ;;  %s3306_s1 = inlined_call_operand.hbm [shape: bf16[16,224], index: 1, kind: input, shape index: {}]   ;;  %s3307_s2 = inlined_call_operand.hbm [shape: bf16[32,192], index: 2, kind: input, shape index: {}]   ;;  %s3308_s3 = inlined_call_operand.hbm [shape: bf16[2,4,16,32], index: 3, kind: input, shape index: {}]   ;;  %s3309_s4 = inlined_call_operand.hbm [shape: bf16[4,32,32], index: 4, kind: input, shape index: {}]   ;;  %s3310_s5 = inlined_call_operand.vmem [shape: f32[13,32], index: 5, kind: input, shape index: {}]   ;;  %s3311_s6 = inlined_call_operand.hbm [shape: f32[16,32], index: 6, kind: output, shape index: {}]  }
   0x1   :  { %12 = vsyncpa [#allocation6], 0 }
   0x2   :  { %13 = vsyncpa [#allocation9], 0 }
   0x3   :  { %14 = vsyncpa [#allocation4], 0  ;;  %s2833_s21 = smov [#allocation5]   ;;  %s2834_s23 = smov [#allocation8]  }
   0x4   :  { %s32_s22 = sshll.u32 %s2833_s21, 4  ;;  %s56_s24 = sshll.u32 %s2834_s23, 4  ;;  %s33_s22 = int_to_ptr.vmem [resolvable:$true] %s32_s22  ;;  %s2884_s24 = int_to_ptr.vmem [resolvable:$true] %s56_s24 }
   0x5   :  { %s2693_s27 = scalar_lea.hbm %s3306_s1, 256 }
   0x6   :  { %p2694_p0 = scmp.ne.s32.totalorder %s3306_s1, %s2693_s27  ;;  %p2697_p1 = scmp.lt.u32.totalorder %s2693_s27, %s3306_s1 }
   0x8   :  { %p2699_p2 = pnand %p2697_p1, %p2694_p0 }
   0xa   :  { %2702 = shalt.err (!%p2699_p2)
}
   0xb   :  { %s2703_s8 = scalar_lea.vmem %s33_s22, 256  ;;  %p2708_p4 = scmp.lt.s32.totalorder %s33_s22, %s33_s22 }
   0xc   :  { %p2704_p3 = scmp.ne.s32.totalorder %s33_s22, %s2703_s8  ;;  %p2709_p5 = scmp.lt.s32.totalorder %s2703_s8, %s2703_s8 }
   0xe   :  { %p2710_p6 = por %p2709_p5, %p2708_p4 }
  0x10   :  { %p2711_p7 = pnand %p2710_p6, %p2704_p3 }
  0x12   :  { %2714 = shalt.err (!%p2711_p7)
}
  0x13   :  { %s2835_s9 = smov 128   ;;  %s2836_s10 = smov 8  }
  0x14   :  { %38 = dma.hbm_to_vmem [thread:$0]  %s3306_s1, 256, %s33_s22, [#allocation6], %s2835_s9, %s2835_s9, %s2836_s10  }
  0x15   :  { %s2715_s15 = scalar_lea.hbm %s3308_s3, 1024 }
  0x16   :  { %p2716_p8 = scmp.ne.s32.totalorder %s3308_s3, %s2715_s15  ;;  %p2719_p9 = scmp.lt.u32.totalorder %s2715_s15, %s3308_s3 }
  0x18   :  { %p2721_p10 = pnand %p2719_p9, %p2716_p8 }
  0x1a   :  { %2724 = shalt.err (!%p2721_p10)
}
  0x1b   :  { %s2725_s20 = scalar_lea.vmem %s2884_s24, 1024  ;;  %p2730_p12 = scmp.lt.s32.totalorder %s2884_s24, %s2884_s24 }
  0x1c   :  { %p2726_p11 = scmp.ne.s32.totalorder %s2884_s24, %s2725_s20  ;;  %p2731_p13 = scmp.lt.s32.totalorder %s2725_s20, %s2725_s20 }
  0x1e   :  { %p2732_p0 = por %p2731_p13, %p2730_p12 }
  0x20   :  { %p2733_p1 = pnand %p2732_p0, %p2726_p11 }
  0x22   :  { %2736 = shalt.err (!%p2733_p1)
}
  0x23   :  { %s2837_s1 = smov 64   ;;  %s2838_s21 = smov 4  }
  0x24   :  { %62 = dma.hbm_to_vmem [thread:$0]  %s3308_s3, 1024, %s2884_s24, [#allocation9], %s2837_s1, %s2837_s1, %s2838_s21  }
  0x25   :  { %s2839_s25 = smov [#allocation2]   ;;  %s2840_s27 = smov [#allocation7]  }
  0x26   :  { %s20_s26 = sshll.u32 %s2839_s25, 4  ;;  %s44_s28 = sshll.u32 %s2840_s27, 4  ;;  %s21_s26 = int_to_ptr.vmem [resolvable:$true] %s20_s26  ;;  %s2921_s28 = int_to_ptr.vmem [resolvable:$true] %s44_s28 }
  0x27   :  { %s2737_s7 = scalar_lea.hbm %s3305_s0, 256 }
  0x28   :  { %p2738_p2 = scmp.ne.s32.totalorder %s3305_s0, %s2737_s7  ;;  %p2741_p3 = scmp.lt.u32.totalorder %s2737_s7, %s3305_s0 }
  0x2a   :  { %p2743_p4 = pnand %p2741_p3, %p2738_p2 }
  0x2c   :  { %2746 = shalt.err (!%p2743_p4)
}
  0x2d   :  { %s2747_s3 = scalar_lea.vmem %s21_s26, 256  ;;  %p2752_p6 = scmp.lt.s32.totalorder %s21_s26, %s21_s26 }
  0x2e   :  { %p2748_p5 = scmp.ne.s32.totalorder %s21_s26, %s2747_s3  ;;  %p2753_p7 = scmp.lt.s32.totalorder %s2747_s3, %s2747_s3 }
  0x30   :  { %p2754_p8 = por %p2753_p7, %p2752_p6 }
  0x32   :  { %p2755_p9 = pnand %p2754_p8, %p2748_p5 }
  0x34   :  { %2758 = shalt.err (!%p2755_p9)
}
  0x35   :  { %26 = dma.hbm_to_vmem [thread:$0]  %s3305_s0, 256, %s21_s26, [#allocation3], %s2835_s9, %s2835_s9, %s2836_s10  }
  0x36   :  { %s2759_s17 = scalar_lea.hbm %s3307_s2, 512 }
  0x37   :  { %p2760_p10 = scmp.ne.s32.totalorder %s3307_s2, %s2759_s17  ;;  %p2763_p11 = scmp.lt.u32.totalorder %s2759_s17, %s3307_s2 }
  0x39   :  { %p2765_p12 = pnand %p2763_p11, %p2760_p10 }
  0x3b   :  { %2768 = shalt.err (!%p2765_p12)
}
  0x3c   :  { %s2769_s23 = scalar_lea.vmem %s2921_s28, 512  ;;  %p2774_p0 = scmp.lt.s32.totalorder %s2921_s28, %s2921_s28 }
  0x3d   :  { %p2770_p13 = scmp.ne.s32.totalorder %s2921_s28, %s2769_s23  ;;  %p2775_p1 = scmp.lt.s32.totalorder %s2769_s23, %s2769_s23 }
  0x3f   :  { %p2776_p2 = por %p2775_p1, %p2774_p0 }
  0x41   :  { %p2777_p3 = pnand %p2776_p2, %p2770_p13 }
  0x43   :  { %2780 = shalt.err (!%p2777_p3)
}
  0x44   :  { %50 = dma.hbm_to_vmem [thread:$0]  %s3307_s2, 512, %s2921_s28, [#allocation6], %s2835_s9, %s2835_s9, %s2836_s10  }
  0x45   :  { %s2841_s26 = smov [#allocation10]   ;;  %s2781_s7 = scalar_lea.hbm %s3309_s4, 1024 }
  0x46   :  { %s68_s27 = sshll.u32 %s2841_s26, 4  ;;  %p2782_p4 = scmp.ne.s32.totalorder %s3309_s4, %s2781_s7  ;;  %s69_s27 = int_to_ptr.vmem [resolvable:$true] %s68_s27 }
  0x47   :  { %p2785_p5 = scmp.lt.u32.totalorder %s2781_s7, %s3309_s4 }
  0x49   :  { %p2787_p6 = pnand %p2785_p5, %p2782_p4 }
  0x4b   :  { %2790 = shalt.err (!%p2787_p6)
}
  0x4c   :  { %s2791_s3 = scalar_lea.vmem %s69_s27, 1024  ;;  %p2796_p8 = scmp.lt.s32.totalorder %s69_s27, %s69_s27 }
  0x4d   :  { %p2792_p7 = scmp.ne.s32.totalorder %s69_s27, %s2791_s3  ;;  %p2797_p9 = scmp.lt.s32.totalorder %s2791_s3, %s2791_s3 }
  0x4f   :  { %p2798_p10 = por %p2797_p9, %p2796_p8 }
  0x51   :  { %p2799_p11 = pnand %p2798_p10, %p2792_p7 }
  0x53   :  { %2802 = shalt.err (!%p2799_p11)
}
  0x54   :  { %74 = dma.hbm_to_vmem [thread:$0]  %s3309_s4, 1024, %s69_s27, [#allocation9], %s2837_s1, %s2837_s1, %s2838_s21  }
  0x55   :  { %2825 = dma.done.wait [#allocation3], 256  }
  0x56   :  { %2826 = vsyncadd [#allocation3], 4294967040 }
  0x57   :  { %2827 = dma.done.wait [#allocation6], 768  }
  0x58   :  { %2828 = vsyncadd [#allocation6], 4294966528 }
  0x59   :  { %2829 = dma.done.wait [#allocation9], 2048  }
  0x5a   :  { %2830 = vsyncadd [#allocation9], 4294965248  ;;  %v2842_v0 = vmov 0   ;;  %v2579_v1 = vld [vmem:[#allocation5 + $0x4] ss:$8 sps:$4 sm:$0xff]   ;;  %v93_v3 = vld [vmem:[#allocation2] sm:$0xff] }
  0x5b   :  { %146 = vmatprep.mubr.bf16.mxu0 %v2842_v0  ;;  %v2581_v2 = vld [vmem:[#allocation5] ss:$8 sps:$4 sm:$0xff]   ;;  %v94_v4 = vld [vmem:[#allocation2 + $0x8] sm:$0xff]  ;;  %vm110_vm0 = vcmask 130048   ;;  %114 = vmatprep.subr.bf16.mxu0 %v2579_v1  ;;  %v2843_v6 = vmov 0.0   ;;  %vm2844_vm1 = vmmov 0  }
  0x5c   :  { %v99_v5 = vpack.c.bf16 %v94_v4, %v93_v3  ;;  %115 = vmatpush1.bf16.msra.mxu0 %v2581_v2  ;;  %2327 = vmatprep.subr.bf16.mxu1 %v2843_v6  ;;  %s2845_s4 = smov 80   ;;  %s2846_s21 = smov 112   ;;  %vm895_vm2 = vcmask 261120  }
  0x5d   :  { %2333 = vmatprep.subr.bf16.mxu0 %v2843_v6  ;;  %2329 = vmatprep.mubr.msk.bf16.mxu1 %vm2844_vm1, %v2843_v6  ;;  %s2847_s24 = smov 96  }
  0x5f   :  { %2217 = vmatmul.mubr.msk.bf16.vlgmr.msra.gmra.mrb[0].mxu0 %vm110_vm0, %v99_v5 }
  0x60   :  { %2335 = vmatprep.mubr.msk.bf16.mxu0 %vm2844_vm1, %v2843_v6 }
 0x132   :  { %v148_v7 = vpop.f32.mrb[0].mxu0 }
 0x133   :  { %v2977_v8 = vpop.f32.mrb[1].mxu0 }
 0x134   :  { %v152_v9 = vpop.f32.mrb[2].mxu0 }
 0x135   :  { %v2983_v10 = vpop.f32.mrb[3].mxu0  ;;  %v2529_v11 = vpack.i.bf16 %v152_v9, %v148_v7  ;;  %v207_v12 = vpack.c.bf16 %v152_v9, %v148_v7 }
 0x136   :  { %v503_v13 = vpack.c.bf16 %v2983_v10, %v2977_v8  ;;  %v2989_v14 = vpack.i.bf16 %v2983_v10, %v2977_v8 }
 0x137   :  { %2530 = vrot.lane.b32.xlu1 %v2529_v11, %s2845_s4  ;;  %2520 = vrot.lane.b32.xlu0 %v2529_v11, %s2846_s21 }
 0x13b   :  { %2525 = vrot.lane.b32.xlu0 %v2529_v11, %s2847_s24  ;;  %212 = vrot.lane.b32.xlu1 %v207_v12, %s2837_s1 }
 0x1a9   :  { %v2531_v15 = vpop.permute.xlu1 %2530  ;;  %v2521_v16 = vpop.permute.xlu0 %2520 }
 0x1aa   :  { %v2523_v17 = vunpack.i.h.bf16 %v2521_v16  ;;  %v2522_v18 = vunpack.i.l.bf16 %v2521_v16  ;;  %v2533_v19 = vunpack.i.h.bf16 %v2531_v15  ;;  %v2532_v20 = vunpack.i.l.bf16 %v2531_v15 }
 0x1ac   :  { %v208_v21 = vpack.c.bf16 %v2523_v17, %v2522_v18  ;;  %v210_v27 = vpack.c.bf16 %v2533_v19, %v2532_v20 }
 0x1ad   :  { %v2526_v22 = vpop.permute.xlu0 %2525  ;;  %v213_v23 = vpop.permute.xlu1 %212 }
 0x1ae   :  { %v2528_v24 = vunpack.i.h.bf16 %v2526_v22  ;;  %v2527_v25 = vunpack.i.l.bf16 %v2526_v22  ;;  %262 = vrot.lane.b32.xlu0 %v208_v21, %s2837_s1  ;;  %v218_v26 = vsel %vm110_vm0, %v213_v23, 0 }
 0x1af   :  { %2328 = vmatpush3.bf16.xpose.msra.mxu1 %v218_v26 }
 0x1b0   :  { %v209_v28 = vpack.c.bf16 %v2528_v24, %v2527_v25  ;;  %2339 = vmatprep.subr.bf16.mxu1 %v2843_v6 }
 0x1b2   :  { %362 = vrot.lane.b32.xlu0 %v210_v27, %s2837_s1  ;;  %312 = vrot.lane.b32.xlu1 %v209_v28, %s2837_s1 }
 0x1b6   :  { %2330 = vmatmul.mubr.msk.bf16.vlgmr.msra.gmra.mrb[0].mxu1 %vm110_vm0, %v207_v12 }
 0x1b7   :  { %2341 = vmatprep.mubr.msk.bf16.mxu1 %vm2844_vm1, %v2843_v6 }
 0x220   :  { %v263_v29 = vpop.permute.xlu0 %262 }
 0x221   :  { %v268_v30 = vsel %vm110_vm0, %v263_v29, 0 }
 0x222   :  { %2334 = vmatpush3.bf16.xpose.msra.mxu0 %v268_v30 }
 0x223   :  { %2345 = vmatprep.subr.bf16.mxu0 %v2843_v6 }
 0x224   :  { %v313_v31 = vpop.permute.xlu1 %312  ;;  %v363_v33 = vpop.permute.xlu0 %362 }
 0x225   :  { %v318_v32 = vsel %vm110_vm0, %v313_v31, 0  ;;  %v368_v34 = vsel %vm110_vm0, %v363_v33, 0 }
 0x226   :  { %2340 = vmatpush3.bf16.xpose.msra.mxu1 %v318_v32 }
 0x227   :  { %2351 = vmatprep.subr.bf16.mxu1 %v2843_v6 }
 0x229   :  { %2336 = vmatmul.mubr.msk.bf16.vlgmr.msra.gmra.mrb[4].mxu0 %vm110_vm0, %v208_v21 }
 0x22a   :  { %2346 = vmatpush3.bf16.xpose.msra.mxu0 %v368_v34  ;;  %2347 = vmatprep.mubr.msk.bf16.mxu0 %vm2844_vm1, %v2843_v6 }
 0x22b   :  { %2357 = vmatprep.subr.bf16.mxu0 %v2843_v6 }
 0x22d   :  { %2342 = vmatmul.mubr.msk.bf16.vlgmr.msra.gmra.mrb[4].mxu1 %vm110_vm0, %v209_v28 }
 0x22e   :  { %2352 = vmatpush3.bf16.msra.mxu1 %v503_v13  ;;  %2353 = vmatprep.mubr.msk.bf16.mxu1 %vm2844_vm1, %v2843_v6 }
 0x22f   :  { %2363 = vmatprep.subr.bf16.mxu1 %v2843_v6 }
 0x231   :  { %2348 = vmatmul.mubr.msk.bf16.vlgmr.msra.gmra.mrb[8].mxu0 %vm110_vm0, %v210_v27 }
 0x232   :  { %2359 = vmatprep.mubr.msk.bf16.mxu0 %vm2844_vm1, %v2843_v6 }
 0x289   :  { %v254_v35 = vpop.f32.mrb[0].mxu1 }
 0x28a   :  { %v2331_v36 = vpop.f32.mrb[1].mxu1  ;;  %v411_v37 = vsel %vm110_vm0, %v254_v35, -inf }
 0x28b   :  { %412 = vmax.xlane.f32.xlu1 %v411_v37  ;;  %v257_v38 = vpop.f32.mrb[2].mxu1 }
 0x28c   :  { %v2332_v39 = vpop.f32.mrb[3].mxu1  ;;  %v414_v40 = vsel %vm110_vm0, %v257_v38, -inf }
 0x28d   :  { %415 = vmax.xlane.f32.xlu0 %v414_v40  ;;  %v3057_v40 = vld [vmem:[%s3310_s5] sm:$0xff] }
 0x2fc   :  { %v304_v41 = vpop.f32.mrb[4].mxu0 }
 0x2fd   :  { %v2337_v42 = vpop.f32.mrb[5].mxu0  ;;  %v417_v43 = vsel %vm110_vm0, %v304_v41, -inf }
 0x2fe   :  { %418 = vmax.xlane.f32.xlu0 %v417_v43  ;;  %v307_v44 = vpop.f32.mrb[6].mxu0 }
 0x2ff   :  { %v2338_v45 = vpop.f32.mrb[7].mxu0  ;;  %v420_v46 = vsel %vm110_vm0, %v307_v44, -inf }
 0x300   :  { %v354_v47 = vpop.f32.mrb[4].mxu1  ;;  %421 = vmax.xlane.f32.xlu1 %v420_v46 }
 0x301   :  { %v2343_v48 = vpop.f32.mrb[5].mxu1  ;;  %v423_v49 = vsel %vm110_vm0, %v354_v47, -inf }
 0x302   :  { %v357_v50 = vpop.f32.mrb[6].mxu1  ;;  %424 = vmax.xlane.f32.xlu0 %v423_v49 }
 0x303   :  { %v2344_v51 = vpop.f32.mrb[7].mxu1  ;;  %v426_v52 = vsel %vm110_vm0, %v357_v50, -inf }
 0x304   :  { %427 = vmax.xlane.f32.xlu1 %v426_v52  ;;  %v404_v53 = vpop.f32.mrb[8].mxu0 }
 0x305   :  { %v2349_v54 = vpop.f32.mrb[9].mxu0  ;;  %v429_v55 = vsel %vm110_vm0, %v404_v53, -inf }
 0x306   :  { %430 = vmax.xlane.f32.xlu0 %v429_v55  ;;  %v3026_v56 = vpop.f32.mrb[10].mxu0 }
 0x307   :  { %v2350_v57 = vpop.f32.mrb[11].mxu0  ;;  %v432_v58 = vsel %vm110_vm0, %v3026_v56, -inf }
 0x308   :  { %433 = vmax.xlane.f32.xlu1 %v432_v58 }
 0x318   :  { %v413_v59 = vpop.xlane.xlu1 %412 }
 0x319   :  { %v435_v60 = vsub.f32 %v254_v35, %v413_v59  ;;  %v157_v35 = vlaneseq }
 0x31a   :  { %v416_v61 = vpop.xlane.xlu0 %415 }
 0x31b   :  { %v443_v62 = vmul.f32 1.442695, %v435_v60  ;;  %v436_v63 = vsub.f32 %v257_v38, %v416_v61  ;;  %v3049_v36 = vshrl.u32 %v157_v35, 7 }
 0x31d   :  { %2604 = vpow2.f32 %v443_v62  ;;  %v445_v1 = vmul.f32 1.442695, %v436_v63  ;;  %v159_v39 = vsub.s32 0, %v3049_v36 }
 0x31f   :  { %2606 = vpow2.f32 %v445_v1  ;;  %v160_v42 = vrot.slane %v3057_v40, %v159_v39 }
 0x327   :  { %v2605_v2 = vpop.eup %2604 }
 0x328   :  { %v459_v3 = vsel %vm110_vm0, %v2605_v2, 0.0 }
 0x329   :  { %v2607_v4 = vpop.eup %2606  ;;  %460 = vadd.xlane.f32.xlu0 %v459_v3 }
 0x32a   :  { %v462_v5 = vsel %vm110_vm0, %v2607_v4, 0.0 }
 0x32b   :  { %463 = vadd.xlane.f32.xlu1 %v462_v5 }
 0x38b   :  { %v419_v7 = vpop.xlane.xlu0 %418 }
 0x38c   :  { %v437_v9 = vsub.f32 %v304_v41, %v419_v7 }
 0x38d   :  { %v422_v11 = vpop.xlane.xlu1 %421 }
 0x38e   :  { %v447_v12 = vmul.f32 1.442695, %v437_v9  ;;  %v438_v13 = vsub.f32 %v307_v44, %v422_v11 }
 0x38f   :  { %v425_v15 = vpop.xlane.xlu0 %424 }
 0x390   :  { %2608 = vpow2.f32 %v447_v12  ;;  %v449_v16 = vmul.f32 1.442695, %v438_v13  ;;  %v439_v17 = vsub.f32 %v354_v47, %v425_v15 }
 0x391   :  { %v428_v18 = vpop.xlane.xlu1 %427 }
 0x392   :  { %2610 = vpow2.f32 %v449_v16  ;;  %v451_v19 = vmul.f32 1.442695, %v439_v17  ;;  %v440_v20 = vsub.f32 %v357_v50, %v428_v18  ;;  %v2582_v17 = vld [vmem:[#allocation8] sm:$0xff]  }
 0x393   :  { %v431_v21 = vpop.xlane.xlu0 %430 }
 0x394   :  { %2612 = vpow2.f32 %v451_v19  ;;  %v453_v22 = vmul.f32 1.442695, %v440_v20  ;;  %v441_v23 = vsub.f32 %v404_v53, %v431_v21 }
 0x395   :  { %v434_v37 = vpop.xlane.xlu1 %433 }
 0x396   :  { %2614 = vpow2.f32 %v453_v22  ;;  %v455_v24 = vmul.f32 1.442695, %v441_v23  ;;  %v442_v44 = vsub.f32 %v3026_v56, %v434_v37 }
 0x398   :  { %2616 = vpow2.f32 %v455_v24  ;;  %v457_v48 = vmul.f32 1.442695, %v442_v44 }
 0x39a   :  { %v3032_v25 = vpop.eup %2608 }
 0x39b   :  { %v465_v26 = vsel %vm110_vm0, %v3032_v25, 0.0 }
 0x39c   :  { %v2611_v27 = vpop.eup %2610  ;;  %466 = vadd.xlane.f32.xlu0 %v465_v26 }
 0x39d   :  { %v468_v28 = vsel %vm110_vm0, %v2611_v27, 0.0 }
 0x39e   :  { %v3037_v29 = vpop.eup %2612  ;;  %469 = vadd.xlane.f32.xlu1 %v468_v28 }
 0x39f   :  { %v471_v30 = vsel %vm110_vm0, %v3037_v29, 0.0 }
 0x3a0   :  { %v3041_v31 = vpop.eup %2614  ;;  %472 = vadd.xlane.f32.xlu0 %v471_v30 }
 0x3a1   :  { %v474_v32 = vsel %vm110_vm0, %v3041_v31, 0.0 }
 0x3a2   :  { %v3045_v33 = vpop.eup %2616  ;;  %475 = vadd.xlane.f32.xlu1 %v474_v32 }
 0x3a3   :  { %v477_v34 = vsel %vm110_vm0, %v3045_v33, 0.0 }
 0x3a4   :  { %478 = vadd.xlane.f32.xlu0 %v477_v34 }
 0x3b3   :  { %2540 = vrot.lane.b32.xlu1 %v2989_v14, %s2847_s24 }
 0x3b6   :  { %v461_v38 = vpop.xlane.xlu0 %460 }
 0x3b7   :  { %2618 = vrcp.f32 %v461_v38 }
 0x3b8   :  { %v464_v41 = vpop.xlane.xlu1 %463 }
 0x3b9   :  { %2620 = vrcp.f32 %v464_v41  ;;  %v2585_v41 = vld [vmem:[#allocation8 + $0x18] sm:$0xff]  }
 0x3ba   :  { %2535 = vrot.lane.b32.xlu0 %v2989_v14, %s2846_s21  ;;  %2622 = vpow2.f32 %v457_v48 }
 0x3be   :  { %162 = vrot.lane.b32.xlu0 %v160_v42, %s2837_s1 }
 0x3c1   :  { %v2619_v43 = vpop.eup %2618 }
 0x3c2   :  { %v491_v46 = vmul.f32 %v2619_v43, %v2605_v2 }
 0x3c3   :  { %v2621_v45 = vpop.eup %2620 }
 0x3c4   :  { %v492_v47 = vmul.f32 %v2621_v45, %v2607_v4  ;;  %v2623_v50 = vpop.eup %2622 }
 0x3c5   :  { %v480_v51 = vsel %vm110_vm0, %v2623_v50, 0.0 }
 0x3c6   :  { %v499_v49 = vpack.c.bf16 %v492_v47, %v491_v46 }
 0x3c8   :  { %2354 = vmatmul.mubr.msk.bf16.vlgmr.msra.gmra.mrb[8].mxu1 %vm110_vm0, %v499_v49 }
 0x3c9   :  { %2365 = vmatprep.mubr.msk.bf16.mxu1 %vm2844_vm1, %v2843_v6 }
 0x3d7   :  { %481 = vadd.xlane.f32.xlu1 %v480_v51 }
 0x3e8   :  { %2545 = vrot.lane.b32.xlu1 %v2989_v14, %s2845_s4 }
 0x429   :  { %v467_v52 = vpop.xlane.xlu0 %466 }
 0x42a   :  { %2624 = vrcp.f32 %v467_v52 }
 0x42b   :  { %v470_v53 = vpop.xlane.xlu1 %469 }
 0x42c   :  { %2626 = vrcp.f32 %v470_v53 }
 0x42d   :  { %v473_v54 = vpop.xlane.xlu0 %472 }
 0x42e   :  { %2628 = vrcp.f32 %v473_v54 }
 0x42f   :  { %v476_v55 = vpop.xlane.xlu1 %475 }
 0x430   :  { %2630 = vrcp.f32 %v476_v55 }
 0x431   :  { %v479_v56 = vpop.xlane.xlu0 %478 }
 0x432   :  { %2632 = vrcp.f32 %v479_v56 }
 0x433   :  { %v2541_v57 = vpop.permute.xlu1 %2540 }
 0x434   :  { %v2543_v58 = vunpack.i.h.bf16 %v2541_v57  ;;  %v2542_v59 = vunpack.i.l.bf16 %v2541_v57  ;;  %v2625_v60 = vpop.eup %2624 }
 0x435   :  { %v2536_v61 = vpop.permute.xlu0 %2535  ;;  %v493_v5 = vmul.f32 %v2625_v60, %v3032_v25 }
 0x436   :  { %v2627_v62 = vpop.eup %2626  ;;  %v505_v63 = vpack.c.bf16 %v2543_v58, %v2542_v59  ;;  %v2538_v1 = vunpack.i.h.bf16 %v2536_v61  ;;  %v2537_v2 = vunpack.i.l.bf16 %v2536_v61 }
 0x437   :  { %v494_v3 = vmul.f32 %v2627_v62, %v2611_v27  ;;  %v2583_v27 = vld [vmem:[#allocation8 + $0x8] sm:$0xff]  }
 0x438   :  { %v2629_v14 = vpop.eup %2628  ;;  %v504_v4 = vpack.c.bf16 %v2538_v1, %v2537_v2  ;;  %2364 = vmatpush3.bf16.msra.mxu1 %v505_v63 }
 0x439   :  { %v163_v7 = vpop.permute.xlu0 %162  ;;  %2375 = vmatprep.subr.bf16.mxu1 %v2843_v6  ;;  %v495_v13 = vmul.f32 %v2629_v14, %v3037_v29  ;;  %v500_v16 = vpack.c.bf16 %v494_v3, %v493_v5 }
 0x43a   :  { %v2631_v9 = vpop.eup %2630  ;;  %2358 = vmatpush3.bf16.msra.mxu0 %v504_v4  ;;  %v166_v11 = vadd.f32 %v163_v7, %v2983_v10  ;;  %v165_v12 = vadd.f32 %v163_v7, %v2977_v8 }
 0x43b   :  { %v496_v15 = vmul.f32 %v2631_v9, %v3041_v31  ;;  %2369 = vmatprep.subr.bf16.mxu0 %v2843_v6  ;;  %v2584_v31 = vld [vmem:[#allocation8 + $0x10] sm:$0xff]  }
 0x43c   :  { %914 = vrot.lane.b32.xlu0 %v166_v11, %s2837_s1  ;;  %912 = vrot.lane.b32.xlu1 %v165_v12, %s2837_s1  ;;  %v2633_v22 = vpop.eup %2632 }
 0x43d   :  { %2360 = vmatmul.mubr.msk.bf16.vlgmr.msra.gmra.mrb[12].mxu0 %vm110_vm0, %v500_v16  ;;  %v501_v18 = vpack.c.bf16 %v496_v15, %v495_v13  ;;  %v497_v24 = vmul.f32 %v2633_v22, %v3045_v33 }
 0x43e   :  { %2371 = vmatprep.mubr.msk.bf16.mxu0 %vm2844_vm1, %v2843_v6 }
 0x43f   :  { %2366 = vmatmul.mubr.msk.bf16.vlgmr.msra.gmra.mrb[12].mxu1 %vm110_vm0, %v501_v18 }
 0x440   :  { %2376 = vmatpush3.bf16.msra.mxu1 %v2582_v17  ;;  %2377 = vmatprep.mubr.msk.bf16.mxu1 %vm2844_vm1, %v2843_v6 }
 0x441   :  { %2387 = vmatprep.subr.bf16.mxu1 %v2843_v6 }
 0x464   :  { %v482_v8 = vpop.xlane.xlu1 %481 }
 0x465   :  { %2634 = vrcp.f32 %v482_v8 }
 0x468   :  { %v2546_v10 = vpop.permute.xlu1 %2545 }
 0x469   :  { %v2548_v19 = vunpack.i.h.bf16 %v2546_v10  ;;  %v2547_v20 = vunpack.i.l.bf16 %v2546_v10 }
 0x46b   :  { %v506_v21 = vpack.c.bf16 %v2548_v19, %v2547_v20 }
 0x46d   :  { %2370 = vmatpush3.bf16.msra.mxu0 %v506_v21 }
 0x46e   :  { %2381 = vmatprep.subr.bf16.mxu0 %v2843_v6 }
 0x46f   :  { %v2635_v23 = vpop.eup %2634 }
 0x470   :  { %v498_v25 = vmul.f32 %v2635_v23, %v2623_v50 }
 0x472   :  { %v502_v26 = vpack.c.bf16 %v498_v25, %v497_v24 }
 0x474   :  { %2372 = vmatmul.mubr.msk.bf16.vlgmr.msra.gmra.mrb[16].mxu0 %vm110_vm0, %v502_v26 }
 0x475   :  { %2383 = vmatprep.mubr.msk.bf16.mxu0 %vm2844_vm1, %v2843_v6  ;;  %2382 = vmatpush3.bf16.msra.mxu0 %v2583_v27 }
 0x476   :  { %2393 = vmatprep.subr.bf16.mxu0 %v2843_v6 }
 0x49b   :  { %v544_v28 = vpop.f32.mrb[8].mxu1 }
 0x49c   :  { %v2355_v29 = vpop.f32.mrb[9].mxu1 }
 0x49d   :  { %v547_v30 = vpop.f32.mrb[10].mxu1 }
 0x49e   :  { %v683_v32 = vpack.c.bf16 %v547_v30, %v544_v28  ;;  %v2356_v34 = vpop.f32.mrb[11].mxu1 }
 0x4a0   :  { %2378 = vmatmul.mubr.msk.bf16.vlgmr.msra.gmra.mrb[16].mxu1 %vm110_vm0, %v683_v32 }
 0x4a1   :  { %2388 = vmatpush3.bf16.msra.mxu1 %v2584_v31  ;;  %2389 = vmatprep.mubr.msk.bf16.mxu1 %vm2844_vm1, %v2843_v6 }
 0x4a2   :  { %2399 = vmatprep.subr.bf16.mxu1 %v2843_v6 }
 0x4ae   :  { %v913_v10 = vpop.permute.xlu1 %912  ;;  %v915_v23 = vpop.permute.xlu0 %914 }
 0x510   :  { %v588_v33 = vpop.f32.mrb[12].mxu0 }
 0x511   :  { %v2361_v35 = vpop.f32.mrb[13].mxu0 }
 0x512   :  { %v591_v37 = vpop.f32.mrb[14].mxu0  ;;  %v632_v38 = vpop.f32.mrb[12].mxu1 }
 0x513   :  { %v684_v42 = vpack.c.bf16 %v591_v37, %v588_v33  ;;  %v2362_v43 = vpop.f32.mrb[15].mxu0  ;;  %v2367_v44 = vpop.f32.mrb[13].mxu1 }
 0x514   :  { %v635_v45 = vpop.f32.mrb[14].mxu1 }
 0x515   :  { %v685_v46 = vpack.c.bf16 %v635_v45, %v632_v38  ;;  %v2368_v47 = vpop.f32.mrb[15].mxu1  ;;  %2384 = vmatmul.mubr.msk.bf16.vlgmr.msra.gmra.mrb[20].mxu0 %vm110_vm0, %v684_v42  ;;  %v2586_v38 = vld [vmem:[#allocation10] sm:$0xff]  }
 0x516   :  { %2394 = vmatpush3.bf16.msra.mxu0 %v2585_v41  ;;  %2395 = vmatprep.mubr.msk.bf16.mxu0 %vm2844_vm1, %v2843_v6  ;;  %v2587_v41 = vld [vmem:[#allocation10 + $0x8] sm:$0xff]  }
 0x517   :  { %2390 = vmatmul.mubr.msk.bf16.vlgmr.msra.gmra.mrb[20].mxu1 %vm110_vm0, %v685_v46  ;;  %2407 = vmatprep.subr.bf16.mxu0 %v2843_v6 }
 0x518   :  { %2403 = vmatprep.mubr.msk.bf16.mxu1 %vm2844_vm1, %v2843_v6  ;;  %2400 = vmatpush3.bf16.msra.mxu1 %v2586_v38 }
 0x519   :  { %2401 = vmatprep.subr.bf16.mxu1 %v2843_v6 }
 0x51c   :  { %2402 = vmatpush3.bf16.msra.mxu1 %v2587_v41 }
 0x547   :  { %v676_v48 = vpop.f32.mrb[16].mxu0 }
 0x548   :  { %v2373_v49 = vpop.f32.mrb[17].mxu0 }
 0x549   :  { %v679_v50 = vpop.f32.mrb[18].mxu0 }
 0x54a   :  { %v686_v51 = vpack.c.bf16 %v679_v50, %v676_v48  ;;  %v2374_v52 = vpop.f32.mrb[19].mxu0  ;;  %v949_v48 = vsub.s32 1, %v3049_v36  ;;  %v955_v50 = vsub.s32 2, %v3049_v36 }
 0x54c   :  { %2396 = vmatmul.mubr.msk.bf16.vlgmr.msra.gmra.mrb[24].mxu0 %vm110_vm0, %v686_v51  ;;  %v950_v49 = vrot.slane %v3057_v40, %v949_v48 }
 0x54d   :  { %2411 = vmatprep.mubr.msk.bf16.mxu0 %vm2844_vm1, %v2843_v6 }
 0x573   :  { %v738_v53 = vpop.f32.mrb[16].mxu1 }
 0x574   :  { %v2379_v54 = vpop.f32.mrb[17].mxu1  ;;  %v896_v58 = vsel %vm895_vm2, %v738_v53, 0.0 }
 0x575   :  { %v741_v55 = vpop.f32.mrb[18].mxu1 }
 0x576   :  { %v2380_v56 = vpop.f32.mrb[19].mxu1  ;;  %v903_v1 = vsel %vm895_vm2, %v741_v55, 0.0 }
 0x577   :  { %v956_v56 = vrot.slane %v3057_v40, %v955_v50 }
 0x5e8   :  { %v788_v57 = vpop.f32.mrb[20].mxu0 }
 0x5e9   :  { %v897_v59 = vsel %vm895_vm2, %v788_v57, 0.0  ;;  %v2385_v60 = vpop.f32.mrb[21].mxu0 }
 0x5ea   :  { %v898_v61 = vadd.f32 %v897_v59, %v896_v58  ;;  %v791_v62 = vpop.f32.mrb[22].mxu0  ;;  %v838_v63 = vpop.f32.mrb[20].mxu1 }
 0x5eb   :  { %v904_v2 = vsel %vm895_vm2, %v791_v62, 0.0  ;;  %v899_v3 = vsel %vm895_vm2, %v838_v63, 0.0  ;;  %v2386_v14 = vpop.f32.mrb[23].mxu0  ;;  %v2391_v4 = vpop.f32.mrb[21].mxu1  ;;  %v2589_v62 = vld [vmem:[#allocation10 + $0x18] sm:$0xff]   ;;  %v966_v63 = vsub.s32 3, %v3049_v36 }
 0x5ec   :  { %v905_v5 = vadd.f32 %v904_v2, %v903_v1  ;;  %v900_v7 = vadd.f32 %v899_v3, %v898_v61  ;;  %v841_v9 = vpop.f32.mrb[22].mxu1  ;;  %v2588_v61 = vld [vmem:[#allocation10 + $0x10] sm:$0xff]  }
 0x5ed   :  { %v906_v11 = vsel %vm895_vm2, %v841_v9, 0.0  ;;  %v2392_v12 = vpop.f32.mrb[23].mxu1  ;;  %2408 = vmatpush3.bf16.msra.mxu0 %v2588_v61  ;;  %v967_v1 = vrot.slane %v3057_v40, %v966_v63 }
 0x5ee   :  { %v907_v13 = vadd.f32 %v906_v11, %v905_v5  ;;  %2409 = vmatprep.subr.bf16.mxu0 %v2843_v6  ;;  %v1034_v12 = vsub.s32 4, %v3049_v36 }
 0x5f1   :  { %2410 = vmatpush3.bf16.msra.mxu0 %v2589_v62 }
 0x5f2   :  { %2415 = vmatprep.subr.bf16.mxu0 %v2843_v6 }
 0x61f   :  { %v888_v15 = vpop.f32.mrb[24].mxu0 }
 0x620   :  { %v901_v16 = vsel %vm895_vm2, %v888_v15, 0.0  ;;  %v2397_v17 = vpop.f32.mrb[25].mxu0 }
 0x621   :  { %v902_v18 = vadd.f32 %v901_v16, %v900_v7  ;;  %v891_v8 = vpop.f32.mrb[26].mxu0 }
 0x622   :  { %v908_v19 = vsel %vm895_vm2, %v891_v8, 0.0  ;;  %v2398_v20 = vpop.f32.mrb[27].mxu0 }
 0x623   :  { %v909_v21 = vadd.f32 %v908_v19, %v907_v13  ;;  %v918_v22 = vadd.f32 %v913_v10, %v902_v18  ;;  %v1035_v13 = vrot.slane %v3057_v40, %v1034_v12 }
 0x625   :  { %v920_v24 = vsel %vm895_vm2, %v918_v22, 0.0  ;;  %v919_v25 = vadd.f32 %v915_v23, %v909_v21 }
 0x626   :  { %921 = vadd.xlane.f32.xlu1 %v920_v24 }
 0x627   :  { %v923_v26 = vsel %vm895_vm2, %v919_v25, 0.0 }
 0x628   :  { %924 = vadd.xlane.f32.xlu0 %v923_v26 }
 0x6b3   :  { %v922_v27 = vpop.xlane.xlu1 %921 }
 0x6b4   :  { %v927_v28 = vmul.f32 0.03125, %v922_v27 }
 0x6b5   :  { %v925_v29 = vpop.xlane.xlu0 %924 }
 0x6b6   :  { %v929_v30 = vsub.f32 %v918_v22, %v927_v28  ;;  %v928_v31 = vmul.f32 0.03125, %v925_v29 }
 0x6b8   :  { %v930_v32 = vsub.f32 %v919_v25, %v928_v31  ;;  %v931_v34 = vmul.f32 %v929_v30, %v929_v30 }
 0x6ba   :  { %v933_v33 = vsel %vm895_vm2, %v931_v34, 0.0  ;;  %v932_v35 = vmul.f32 %v930_v32, %v930_v32  ;;  %v2592_v34 = vld [vmem:[#allocation7 + $0x4] ss:$8 sps:$4 sm:$0xff]  }
 0x6bb   :  { %934 = vadd.xlane.f32.xlu0 %v933_v33  ;;  %v2590_v33 = vld [vmem:[#allocation7] ss:$8 sps:$4 sm:$0xff]   ;;  %1160 = vmatprep.subr.bf16.mxu1 %v2592_v34 }
 0x6bc   :  { %v936_v37 = vsel %vm895_vm2, %v932_v35, 0.0  ;;  %v2593_v35 = vld [vmem:[#allocation7 + $0x10] ss:$8 sps:$4 sm:$0xff]  }
 0x6bd   :  { %937 = vadd.xlane.f32.xlu1 %v936_v37  ;;  %v2595_v37 = vld [vmem:[#allocation7 + $0x14] ss:$8 sps:$4 sm:$0xff]  }
 0x748   :  { %v935_v42 = vpop.xlane.xlu0 %934 }
 0x749   :  { %v939_v43 = vmul.f32 0.03125, %v935_v42 }
 0x74a   :  { %v938_v44 = vpop.xlane.xlu1 %937 }
 0x74b   :  { %v941_v45 = vadd.f32 1e-05, %v939_v43  ;;  %v940_v46 = vmul.f32 0.03125, %v938_v44 }
 0x74d   :  { %2636 = vrsqrt.f32 %v941_v45  ;;  %v942_v47 = vadd.f32 1e-05, %v940_v46  ;;  %v1122_v46 = vsub.s32 5, %v3049_v36 }
 0x74f   :  { %2638 = vrsqrt.f32 %v942_v47  ;;  %v1123_v47 = vrot.slane %v3057_v40, %v1122_v46 }
 0x757   :  { %v2637_v51 = vpop.eup %2636 }
 0x758   :  { %v945_v52 = vmul.f32 %v2637_v51, %v929_v30 }
 0x759   :  { %v2639_v53 = vpop.eup %2638 }
 0x75a   :  { %v951_v54 = vmul.f32 %v950_v49, %v945_v52  ;;  %v946_v55 = vmul.f32 %v2639_v53, %v930_v32 }
 0x75c   :  { %v952_v57 = vmul.f32 %v950_v49, %v946_v55  ;;  %v957_v58 = vadd.f32 %v956_v56, %v951_v54  ;;  %v1128_v49 = vsub.s32 6, %v3049_v36 }
 0x75e   :  { %v958_v59 = vadd.f32 %v956_v56, %v952_v57  ;;  %v1129_v56 = vrot.slane %v3057_v40, %v1128_v49 }
 0x760   :  { %v959_v60 = vpack.c.bf16 %v958_v59, %v957_v58 }
 0x762   :  { %2404 = vmatmul.mubr.msk.bf16.vlgmr.msra.gmra.mrb[24].mxu1 %vm895_vm2, %v959_v60 }
 0x763   :  { %1192 = vmatprep.mubr.bf16.mxu1 %v2842_v0  ;;  %1161 = vmatpush1.bf16.msra.mxu1 %v2590_v33 }
 0x764   :  { %1162 = vmatprep.subr.bf16.mxu1 %v2595_v37 }
 0x767   :  { %1163 = vmatpush1.bf16.msra.mxu1 %v2593_v35 }
 0x768   :  { %2421 = vmatprep.subr.bf16.mxu1 %v2843_v6 }
 0x835   :  { %v1017_v2 = vpop.f32.mrb[24].mxu1 }
 0x836   :  { %v1018_v3 = vadd.f32 %v1017_v2, %v967_v1  ;;  %v2405_v14 = vpop.f32.mrb[25].mxu1 }
 0x837   :  { %v1020_v4 = vpop.f32.mrb[26].mxu1 }
 0x838   :  { %v1021_v5 = vadd.f32 %v1020_v4, %v967_v1  ;;  %v2406_v0 = vpop.f32.mrb[27].mxu1  ;;  %v1024_v7 = vmax.f32 %v1018_v3, 0.0 }
 0x83a   :  { %v1025_v9 = vmax.f32 %v1021_v5, 0.0 }
 0x83c   :  { %v1026_v11 = vpack.c.bf16 %v1025_v9, %v1024_v7 }
 0x83e   :  { %2412 = vmatmul.mubr.msk.bf16.vlgmr.msra.gmra.mrb[28].mxu0 %vm895_vm2, %v1026_v11 }
 0x83f   :  { %2417 = vmatprep.mubr.msk.bf16.mxu0 %vm2844_vm1, %v2843_v6 }
 0x911   :  { %v1085_v15 = vpop.f32.mrb[28].mxu0 }
 0x912   :  { %v1086_v16 = vadd.f32 %v1085_v15, %v1035_v13  ;;  %v2413_v17 = vpop.f32.mrb[29].mxu0 }
 0x913   :  { %v1088_v18 = vpop.f32.mrb[30].mxu0 }
 0x914   :  { %v1089_v8 = vadd.f32 %v1088_v18, %v1035_v13  ;;  %v2414_v10 = vpop.f32.mrb[31].mxu0  ;;  %v1092_v19 = vadd.f32 %v1086_v16, %v957_v58 }
 0x916   :  { %v1094_v20 = vsel %vm895_vm2, %v1092_v19, 0.0  ;;  %v1093_v21 = vadd.f32 %v1089_v8, %v958_v59 }
 0x917   :  { %1095 = vadd.xlane.f32.xlu0 %v1094_v20 }
 0x918   :  { %v1097_v22 = vsel %vm895_vm2, %v1093_v21, 0.0 }
 0x919   :  { %1098 = vadd.xlane.f32.xlu1 %v1097_v22 }
 0x9a4   :  { %v1096_v23 = vpop.xlane.xlu0 %1095 }
 0x9a5   :  { %v1100_v24 = vmul.f32 0.03125, %v1096_v23 }
 0x9a6   :  { %v1099_v25 = vpop.xlane.xlu1 %1098 }
 0x9a7   :  { %v1102_v26 = vsub.f32 %v1092_v19, %v1100_v24  ;;  %v1101_v27 = vmul.f32 0.03125, %v1099_v25 }
 0x9a9   :  { %v1103_v28 = vsub.f32 %v1093_v21, %v1101_v27  ;;  %v1104_v29 = vmul.f32 %v1102_v26, %v1102_v26 }
 0x9ab   :  { %v1106_v30 = vsel %vm895_vm2, %v1104_v29, 0.0  ;;  %v1105_v31 = vmul.f32 %v1103_v28, %v1103_v28 }
 0x9ac   :  { %1107 = vadd.xlane.f32.xlu0 %v1106_v30 }
 0x9ad   :  { %v1109_v32 = vsel %vm895_vm2, %v1105_v31, 0.0 }
 0x9ae   :  { %1110 = vadd.xlane.f32.xlu1 %v1109_v32 }
 0xa39   :  { %v1108_v38 = vpop.xlane.xlu0 %1107 }
 0xa3a   :  { %v1112_v41 = vmul.f32 0.03125, %v1108_v38 }
 0xa3b   :  { %v1111_v42 = vpop.xlane.xlu1 %1110 }
 0xa3c   :  { %v1114_v43 = vadd.f32 1e-05, %v1112_v41  ;;  %v1113_v44 = vmul.f32 0.03125, %v1111_v42 }
 0xa3e   :  { %2640 = vrsqrt.f32 %v1114_v43  ;;  %v1115_v45 = vadd.f32 1e-05, %v1113_v44 }
 0xa40   :  { %2642 = vrsqrt.f32 %v1115_v45 }
 0xa48   :  { %v2641_v51 = vpop.eup %2640 }
 0xa49   :  { %v1118_v52 = vmul.f32 %v2641_v51, %v1102_v26 }
 0xa4a   :  { %v2643_v53 = vpop.eup %2642 }
 0xa4b   :  { %v1124_v54 = vmul.f32 %v1123_v47, %v1118_v52  ;;  %v1119_v55 = vmul.f32 %v2643_v53, %v1103_v28 }
 0xa4d   :  { %v1125_v57 = vmul.f32 %v1123_v47, %v1119_v55  ;;  %v3153_v58 = vadd.f32 %v1129_v56, %v1124_v54 }
 0xa4f   :  { %v3155_v59 = vadd.f32 %v1129_v56, %v1125_v57 }
 0xa51   :  { %v1136_v60 = vpack.c.bf16 %v3155_v59, %v3153_v58 }
 0xa53   :  { %2244 = vmatmul.mubr.msk.bf16.vlgmr.msra.gmra.mrb[28].mxu1 %vm895_vm2, %v1136_v60 }
 0xa54   :  { %2423 = vmatprep.mubr.msk.bf16.mxu1 %vm2844_vm1, %v2843_v6 }
 0xb26   :  { %v1194_v61 = vpop.f32.mrb[28].mxu1 }
 0xb27   :  { %v1196_v62 = vpop.f32.mrb[29].mxu1 }
 0xb28   :  { %v1198_v1 = vpop.f32.mrb[30].mxu1 }
 0xb29   :  { %v1200_v2 = vpop.f32.mrb[31].mxu1  ;;  %v2554_v3 = vpack.i.bf16 %v1198_v1, %v1194_v61  ;;  %v1243_v14 = vpack.c.bf16 %v1198_v1, %v1194_v61 }
 0xb2a   :  { %v1539_v40 = vpack.c.bf16 %v1200_v2, %v1196_v62  ;;  %v3162_v4 = vpack.i.bf16 %v1200_v2, %v1196_v62 }
 0xb2b   :  { %2555 = vrot.lane.b32.xlu1 %v2554_v3, %s2847_s24  ;;  %2550 = vrot.lane.b32.xlu0 %v2554_v3, %s2846_s21 }
 0xb2f   :  { %2560 = vrot.lane.b32.xlu1 %v2554_v3, %s2845_s4  ;;  %1248 = vrot.lane.b32.xlu0 %v1243_v14, %s2837_s1 }
 0xb9d   :  { %v2556_v5 = vpop.permute.xlu1 %2555  ;;  %v2551_v0 = vpop.permute.xlu0 %2550 }
 0xb9e   :  { %v2558_v7 = vunpack.i.h.bf16 %v2556_v5  ;;  %v2557_v9 = vunpack.i.l.bf16 %v2556_v5  ;;  %v2553_v11 = vunpack.i.h.bf16 %v2551_v0  ;;  %v2552_v13 = vunpack.i.l.bf16 %v2551_v0 }
 0xba0   :  { %v1244_v15 = vpack.c.bf16 %v2553_v11, %v2552_v13  ;;  %v1245_v16 = vpack.c.bf16 %v2558_v7, %v2557_v9 }
 0xba1   :  { %v2561_v17 = vpop.permute.xlu1 %2560  ;;  %v1249_v18 = vpop.permute.xlu0 %1248 }
 0xba2   :  { %v2563_v8 = vunpack.i.h.bf16 %v2561_v17  ;;  %v2562_v10 = vunpack.i.l.bf16 %v2561_v17  ;;  %v1254_v19 = vsel %vm110_vm0, %v1249_v18, 0  ;;  %1298 = vrot.lane.b32.xlu1 %v1244_v15, %s2837_s1  ;;  %1348 = vrot.lane.b32.xlu0 %v1245_v16, %s2837_s1 }
 0xba3   :  { %2416 = vmatpush3.bf16.xpose.msra.mxu0 %v1254_v19 }
 0xba4   :  { %v1246_v20 = vpack.c.bf16 %v2563_v8, %v2562_v10  ;;  %2427 = vmatprep.subr.bf16.mxu0 %v2843_v6 }
 0xba6   :  { %1398 = vrot.lane.b32.xlu1 %v1246_v20, %s2837_s1 }
 0xbaa   :  { %2418 = vmatmul.mubr.msk.bf16.vlgmr.msra.gmra.mrb[32].mxu0 %vm110_vm0, %v1243_v14 }
 0xbab   :  { %2429 = vmatprep.mubr.msk.bf16.mxu0 %vm2844_vm1, %v2843_v6 }
 0xc14   :  { %v1299_v21 = vpop.permute.xlu1 %1298  ;;  %v1349_v22 = vpop.permute.xlu0 %1348 }
 0xc15   :  { %v1304_v23 = vsel %vm110_vm0, %v1299_v21, 0  ;;  %v1354_v24 = vsel %vm110_vm0, %v1349_v22, 0 }
 0xc16   :  { %2422 = vmatpush3.bf16.xpose.msra.mxu1 %v1304_v23  ;;  %2428 = vmatpush3.bf16.xpose.msra.mxu0 %v1354_v24 }
 0xc17   :  { %2433 = vmatprep.subr.bf16.mxu1 %v2843_v6  ;;  %2439 = vmatprep.subr.bf16.mxu0 %v2843_v6 }
 0xc18   :  { %v1399_v25 = vpop.permute.xlu1 %1398 }
 0xc19   :  { %v1404_v26 = vsel %vm110_vm0, %v1399_v25, 0 }
 0xc1d   :  { %2424 = vmatmul.mubr.msk.bf16.vlgmr.msra.gmra.mrb[32].mxu1 %vm110_vm0, %v1244_v15  ;;  %2430 = vmatmul.mubr.msk.bf16.vlgmr.msra.gmra.mrb[36].mxu0 %vm110_vm0, %v1245_v16 }
 0xc1e   :  { %2434 = vmatpush3.bf16.xpose.msra.mxu1 %v1404_v26  ;;  %2440 = vmatpush3.bf16.msra.mxu0 %v1539_v40 }
 0xc1f   :  { %2435 = vmatprep.mubr.msk.bf16.mxu1 %vm2844_vm1, %v2843_v6  ;;  %2445 = vmatprep.subr.bf16.mxu1 %v2843_v6 }
 0xc20   :  { %2441 = vmatprep.mubr.msk.bf16.mxu0 %vm2844_vm1, %v2843_v6  ;;  %2451 = vmatprep.subr.bf16.mxu0 %v2843_v6 }
 0xc25   :  { %2436 = vmatmul.mubr.msk.bf16.vlgmr.msra.gmra.mrb[36].mxu1 %vm110_vm0, %v1246_v20 }
 0xc26   :  { %2447 = vmatprep.mubr.msk.bf16.mxu1 %vm2844_vm1, %v2843_v6 }
 0xc7d   :  { %v1290_v27 = vpop.f32.mrb[32].mxu0 }
 0xc7e   :  { %v2419_v28 = vpop.f32.mrb[33].mxu0  ;;  %v1447_v29 = vsel %vm110_vm0, %v1290_v27, -inf }
 0xc7f   :  { %1448 = vmax.xlane.f32.xlu0 %v1447_v29  ;;  %v1293_v30 = vpop.f32.mrb[34].mxu0 }
 0xc80   :  { %v2420_v31 = vpop.f32.mrb[35].mxu0  ;;  %v1450_v32 = vsel %vm110_vm0, %v1293_v30, -inf }
 0xc81   :  { %1451 = vmax.xlane.f32.xlu1 %v1450_v32 }
 0xcf0   :  { %v1340_v34 = vpop.f32.mrb[32].mxu1  ;;  %v1390_v33 = vpop.f32.mrb[36].mxu0 }
 0xcf1   :  { %v2425_v35 = vpop.f32.mrb[33].mxu1  ;;  %v2431_v37 = vpop.f32.mrb[37].mxu0  ;;  %v1453_v38 = vsel %vm110_vm0, %v1340_v34, -inf  ;;  %v1459_v41 = vsel %vm110_vm0, %v1390_v33, -inf }
 0xcf2   :  { %v1343_v42 = vpop.f32.mrb[34].mxu1  ;;  %1454 = vmax.xlane.f32.xlu0 %v1453_v38  ;;  %1460 = vmax.xlane.f32.xlu1 %v1459_v41  ;;  %v1393_v43 = vpop.f32.mrb[38].mxu0 }
 0xcf3   :  { %v2426_v44 = vpop.f32.mrb[35].mxu1  ;;  %v2432_v45 = vpop.f32.mrb[39].mxu0  ;;  %v1456_v46 = vsel %vm110_vm0, %v1343_v42, -inf  ;;  %v1462_v52 = vsel %vm110_vm0, %v1393_v43, -inf }
 0xcf6   :  { %1457 = vmax.xlane.f32.xlu0 %v1456_v46 }
 0xcf8   :  { %v1440_v47 = vpop.f32.mrb[36].mxu1 }
 0xcf9   :  { %v2437_v49 = vpop.f32.mrb[37].mxu1  ;;  %v1465_v51 = vsel %vm110_vm0, %v1440_v47, -inf }
 0xcfa   :  { %v1443_v53 = vpop.f32.mrb[38].mxu1  ;;  %1466 = vmax.xlane.f32.xlu1 %v1465_v51  ;;  %1463 = vmax.xlane.f32.xlu0 %v1462_v52 }
 0xcfb   :  { %v2438_v54 = vpop.f32.mrb[39].mxu1  ;;  %v1468_v55 = vsel %vm110_vm0, %v1443_v53, -inf }
 0xcfe   :  { %1469 = vmax.xlane.f32.xlu0 %v1468_v55 }
 0xd0b   :  { %2565 = vrot.lane.b32.xlu1 %v3162_v4, %s2846_s21 }
 0xd0c   :  { %v1449_v61 = vpop.xlane.xlu0 %1448 }
 0xd0d   :  { %v1471_v62 = vsub.f32 %v1290_v27, %v1449_v61 }
 0xd0e   :  { %v1452_v56 = vpop.xlane.xlu1 %1451 }
 0xd0f   :  { %v1472_v57 = vsub.f32 %v1293_v30, %v1452_v56  ;;  %v1479_v2 = vmul.f32 1.442695, %v1471_v62 }
 0xd11   :  { %v1481_v60 = vmul.f32 1.442695, %v1472_v57 }
 0xd13   :  { %2644 = vpow2.f32 %v1481_v60 }
 0xd14   :  { %2646 = vpow2.f32 %v1479_v2 }
 0xd1d   :  { %v3202_v1 = vpop.eup %2644 }
 0xd1e   :  { %v1498_v3 = vsel %vm110_vm0, %v3202_v1, 0.0  ;;  %v2647_v14 = vpop.eup %2646 }
 0xd1f   :  { %1499 = vadd.xlane.f32.xlu0 %v1498_v3  ;;  %v1495_v40 = vsel %vm110_vm0, %v2647_v14, 0.0 }
 0xd2f   :  { %1496 = vadd.xlane.f32.xlu1 %v1495_v40 }
 0xd7f   :  { %v1455_v5 = vpop.xlane.xlu0 %1454  ;;  %v1461_v0 = vpop.xlane.xlu1 %1460 }
 0xd80   :  { %v1473_v7 = vsub.f32 %v1340_v34, %v1455_v5  ;;  %v1475_v9 = vsub.f32 %v1390_v33, %v1461_v0 }
 0xd82   :  { %v1483_v11 = vmul.f32 1.442695, %v1473_v7  ;;  %v1487_v13 = vmul.f32 1.442695, %v1475_v9 }
 0xd83   :  { %v1458_v15 = vpop.xlane.xlu0 %1457 }
 0xd84   :  { %2648 = vpow2.f32 %v1483_v11  ;;  %v1474_v16 = vsub.f32 %v1343_v42, %v1458_v15 }
 0xd85   :  { %2650 = vpow2.f32 %v1487_v13 }
 0xd86   :  { %v1485_v17 = vmul.f32 1.442695, %v1474_v16 }
 0xd87   :  { %v1467_v18 = vpop.xlane.xlu1 %1466  ;;  %v1464_v8 = vpop.xlane.xlu0 %1463 }
 0xd88   :  { %2652 = vpow2.f32 %v1485_v17  ;;  %v1477_v10 = vsub.f32 %v1440_v47, %v1467_v18  ;;  %v1476_v19 = vsub.f32 %v1393_v43, %v1464_v8  ;;  %v2596_v8 = vld [vmem:[#allocation8 + $0x20] sm:$0xff]  }
 0xd8a   :  { %v1491_v20 = vmul.f32 1.442695, %v1477_v10  ;;  %v1489_v21 = vmul.f32 1.442695, %v1476_v19 }
 0xd8b   :  { %v2566_v22 = vpop.permute.xlu1 %2565  ;;  %v1470_v23 = vpop.xlane.xlu0 %1469 }
 0xd8c   :  { %2654 = vpow2.f32 %v1491_v20  ;;  %v2568_v24 = vunpack.i.h.bf16 %v2566_v22  ;;  %v2567_v25 = vunpack.i.l.bf16 %v2566_v22  ;;  %v1478_v26 = vsub.f32 %v1443_v53, %v1470_v23  ;;  %v2597_v23 = vld [vmem:[#allocation8 + $0x28] sm:$0xff]  }
 0xd8d   :  { %2656 = vpow2.f32 %v1489_v21 }
 0xd8e   :  { %v2649_v27 = vpop.eup %2648  ;;  %v1540_v28 = vpack.c.bf16 %v2568_v24, %v2567_v25  ;;  %v1493_v29 = vmul.f32 1.442695, %v1478_v26 }
 0xd8f   :  { %v1501_v30 = vsel %vm110_vm0, %v2649_v27, 0.0  ;;  %v2651_v31 = vpop.eup %2650 }
 0xd90   :  { %2658 = vpow2.f32 %v1493_v29  ;;  %1502 = vadd.xlane.f32.xlu1 %v1501_v30  ;;  %2446 = vmatpush3.bf16.msra.mxu1 %v1540_v28  ;;  %v1507_v34 = vsel %vm110_vm0, %v2651_v31, 0.0 }
 0xd91   :  { %2457 = vmatprep.subr.bf16.mxu1 %v2843_v6 }
 0xd92   :  { %v2653_v32 = vpop.eup %2652 }
 0xd93   :  { %v1504_v33 = vsel %vm110_vm0, %v2653_v32, 0.0 }
 0xd94   :  { %1508 = vadd.xlane.f32.xlu1 %v1507_v34  ;;  %1505 = vadd.xlane.f32.xlu0 %v1504_v33  ;;  %v2599_v34 = vld [vmem:[#allocation8 + $0x38] sm:$0xff]  }
 0xd96   :  { %v2655_v35 = vpop.eup %2654 }
 0xd97   :  { %v2657_v37 = vpop.eup %2656  ;;  %v1513_v38 = vsel %vm110_vm0, %v2655_v35, 0.0 }
 0xd98   :  { %1514 = vadd.xlane.f32.xlu1 %v1513_v38  ;;  %v1510_v41 = vsel %vm110_vm0, %v2657_v37, 0.0 }
 0xd99   :  { %1511 = vadd.xlane.f32.xlu0 %v1510_v41 }
 0xd9a   :  { %v2659_v42 = vpop.eup %2658 }
 0xd9b   :  { %v1516_v43 = vsel %vm110_vm0, %v2659_v42, 0.0 }
 0xd9d   :  { %1517 = vadd.xlane.f32.xlu0 %v1516_v43 }
 0xda9   :  { %2575 = vrot.lane.b32.xlu1 %v3162_v4, %s2845_s4 }
 0xdac   :  { %v1500_v44 = vpop.xlane.xlu0 %1499 }
 0xdad   :  { %2660 = vrcp.f32 %v1500_v44 }
 0xdb3   :  { %2570 = vrot.lane.b32.xlu0 %v3162_v4, %s2847_s24 }
 0xdb7   :  { %v2661_v46 = vpop.eup %2660 }
 0xdb8   :  { %v1528_v49 = vmul.f32 %v2661_v46, %v3202_v1 }
 0xdbc   :  { %v1497_v45 = vpop.xlane.xlu1 %1496 }
 0xdbd   :  { %2662 = vrcp.f32 %v1497_v45 }
 0xdc7   :  { %v2663_v47 = vpop.eup %2662 }
 0xdc8   :  { %v1527_v51 = vmul.f32 %v2663_v47, %v2647_v14 }
 0xdca   :  { %v1535_v52 = vpack.c.bf16 %v1528_v49, %v1527_v51 }
 0xdcc   :  { %2442 = vmatmul.mubr.msk.bf16.vlgmr.msra.gmra.mrb[40].mxu0 %vm110_vm0, %v1535_v52 }
 0xdcd   :  { %2453 = vmatprep.mubr.msk.bf16.mxu0 %vm2844_vm1, %v2843_v6 }
 0xe1d   :  { %v1503_v53 = vpop.xlane.xlu1 %1502 }
 0xe1e   :  { %2664 = vrcp.f32 %v1503_v53 }
 0xe21   :  { %v1509_v54 = vpop.xlane.xlu1 %1508  ;;  %v1506_v55 = vpop.xlane.xlu0 %1505 }
 0xe22   :  { %2666 = vrcp.f32 %v1506_v55 }
 0xe23   :  { %2668 = vrcp.f32 %v1509_v54 }
 0xe25   :  { %v1515_v4 = vpop.xlane.xlu1 %1514 }
 0xe26   :  { %v1512_v56 = vpop.xlane.xlu0 %1511 }
 0xe27   :  { %2670 = vrcp.f32 %v1512_v56 }
 0xe28   :  { %2672 = vrcp.f32 %v1515_v4  ;;  %v2665_v61 = vpop.eup %2664 }
 0xe29   :  { %v2576_v57 = vpop.permute.xlu1 %2575  ;;  %v1529_v3 = vmul.f32 %v2665_v61, %v2649_v27  ;;  %v2598_v27 = vld [vmem:[#allocation8 + $0x30] sm:$0xff]  }
 0xe2a   :  { %v1518_v60 = vpop.xlane.xlu0 %1517  ;;  %v2578_v1 = vunpack.i.h.bf16 %v2576_v57  ;;  %v2577_v2 = vunpack.i.l.bf16 %v2576_v57 }
 0xe2b   :  { %2674 = vrcp.f32 %v1518_v60 }
 0xe2c   :  { %v2667_v62 = vpop.eup %2666  ;;  %v1542_v13 = vpack.c.bf16 %v2578_v1, %v2577_v2 }
 0xe2d   :  { %v1530_v14 = vmul.f32 %v2667_v62, %v2653_v32  ;;  %v2669_v5 = vpop.eup %2668 }
 0xe2e   :  { %v2571_v40 = vpop.permute.xlu0 %2570  ;;  %v1531_v16 = vmul.f32 %v2669_v5, %v2651_v31 }
 0xe2f   :  { %v2573_v0 = vunpack.i.h.bf16 %v2571_v40  ;;  %v2572_v7 = vunpack.i.l.bf16 %v2571_v40  ;;  %v1536_v9 = vpack.c.bf16 %v1530_v14, %v1529_v3 }
 0xe31   :  { %v2671_v11 = vpop.eup %2670  ;;  %v1541_v15 = vpack.c.bf16 %v2573_v0, %v2572_v7  ;;  %2448 = vmatmul.mubr.msk.bf16.vlgmr.msra.gmra.mrb[40].mxu1 %vm110_vm0, %v1536_v9 }
 0xe32   :  { %v1532_v17 = vmul.f32 %v2671_v11, %v2657_v37  ;;  %v2673_v18 = vpop.eup %2672  ;;  %2458 = vmatpush3.bf16.msra.mxu1 %v1542_v13  ;;  %2459 = vmatprep.mubr.msk.bf16.mxu1 %vm2844_vm1, %v2843_v6 }
 0xe33   :  { %2452 = vmatpush3.bf16.msra.mxu0 %v1541_v15  ;;  %2469 = vmatprep.subr.bf16.mxu1 %v2843_v6  ;;  %v1533_v20 = vmul.f32 %v2673_v18, %v2655_v35 }
 0xe34   :  { %v1537_v10 = vpack.c.bf16 %v1532_v17, %v1531_v16  ;;  %2463 = vmatprep.subr.bf16.mxu0 %v2843_v6 }
 0xe35   :  { %v2675_v19 = vpop.eup %2674 }
 0xe36   :  { %v1534_v21 = vmul.f32 %v2675_v19, %v2659_v42  ;;  %2454 = vmatmul.mubr.msk.bf16.vlgmr.msra.gmra.mrb[44].mxu0 %vm110_vm0, %v1537_v10 }
 0xe37   :  { %2464 = vmatpush3.bf16.msra.mxu0 %v2596_v8  ;;  %2465 = vmatprep.mubr.msk.bf16.mxu0 %vm2844_vm1, %v2843_v6 }
 0xe38   :  { %v1538_v22 = vpack.c.bf16 %v1534_v21, %v1533_v20  ;;  %2475 = vmatprep.subr.bf16.mxu0 %v2843_v6 }
 0xe3a   :  { %2460 = vmatmul.mubr.msk.bf16.vlgmr.msra.gmra.mrb[44].mxu1 %vm110_vm0, %v1538_v22 }
 0xe3b   :  { %2471 = vmatprep.mubr.msk.bf16.mxu1 %vm2844_vm1, %v2843_v6  ;;  %2470 = vmatpush3.bf16.msra.mxu1 %v2597_v23 }
 0xe3c   :  { %2481 = vmatprep.subr.bf16.mxu1 %v2843_v6 }
 0xe9f   :  { %v1580_v24 = vpop.f32.mrb[40].mxu0 }
 0xea0   :  { %v2443_v25 = vpop.f32.mrb[41].mxu0 }
 0xea1   :  { %v1583_v26 = vpop.f32.mrb[42].mxu0 }
 0xea2   :  { %v1719_v28 = vpack.c.bf16 %v1583_v26, %v1580_v24  ;;  %v2444_v29 = vpop.f32.mrb[43].mxu0 }
 0xea4   :  { %2466 = vmatmul.mubr.msk.bf16.vlgmr.msra.gmra.mrb[48].mxu0 %vm110_vm0, %v1719_v28 }
 0xea5   :  { %2476 = vmatpush3.bf16.msra.mxu0 %v2598_v27  ;;  %2477 = vmatprep.mubr.msk.bf16.mxu0 %vm2844_vm1, %v2843_v6 }
 0xea6   :  { %2487 = vmatprep.subr.bf16.mxu0 %v2843_v6 }
 0xf04   :  { %v1624_v30 = vpop.f32.mrb[40].mxu1 }
 0xf05   :  { %v2449_v31 = vpop.f32.mrb[41].mxu1 }
 0xf06   :  { %v1627_v32 = vpop.f32.mrb[42].mxu1 }
 0xf07   :  { %v1720_v33 = vpack.c.bf16 %v1627_v32, %v1624_v30  ;;  %v2450_v35 = vpop.f32.mrb[43].mxu1 }
 0xf09   :  { %v1668_v37 = vpop.f32.mrb[44].mxu0  ;;  %2472 = vmatmul.mubr.msk.bf16.vlgmr.msra.gmra.mrb[48].mxu1 %vm110_vm0, %v1720_v33  ;;  %v2600_v33 = vld [vmem:[#allocation10 + $0x20] sm:$0xff]  }
 0xf0a   :  { %v2455_v38 = vpop.f32.mrb[45].mxu0  ;;  %2482 = vmatpush3.bf16.msra.mxu1 %v2599_v34  ;;  %2483 = vmatprep.mubr.msk.bf16.mxu1 %vm2844_vm1, %v2843_v6 }
 0xf0b   :  { %v1671_v41 = vpop.f32.mrb[46].mxu0  ;;  %2495 = vmatprep.subr.bf16.mxu1 %v2843_v6 }
 0xf0c   :  { %v1721_v42 = vpack.c.bf16 %v1671_v41, %v1668_v37  ;;  %v2456_v43 = vpop.f32.mrb[47].mxu0 }
 0xf0d   :  { %v1712_v44 = vpop.f32.mrb[44].mxu1 }
 0xf0e   :  { %v2461_v45 = vpop.f32.mrb[45].mxu1  ;;  %2478 = vmatmul.mubr.msk.bf16.vlgmr.msra.gmra.mrb[52].mxu0 %vm110_vm0, %v1721_v42 }
 0xf0f   :  { %v1715_v46 = vpop.f32.mrb[46].mxu1  ;;  %2491 = vmatprep.mubr.msk.bf16.mxu0 %vm2844_vm1, %v2843_v6  ;;  %2488 = vmatpush3.bf16.msra.mxu0 %v2600_v33  ;;  %v2692_v45 = vld [vmem:[%s3310_s5] sm:$0xff] }
 0xf10   :  { %v1722_v47 = vpack.c.bf16 %v1715_v46, %v1712_v44  ;;  %v2462_v49 = vpop.f32.mrb[47].mxu1  ;;  %2489 = vmatprep.subr.bf16.mxu0 %v2843_v6  ;;  %v1976_v44 = vsub.s32 7, %v3049_v36 }
 0xf11   :  { %v96_v49 = vld [vmem:[%s3310_s5 + $0x8] sm:$0x1f]  ;;  %s2848_s5 = smov [#allocation11]  }
 0xf12   :  { %2484 = vmatmul.mubr.msk.bf16.vlgmr.msra.gmra.mrb[52].mxu1 %vm110_vm0, %v1722_v47  ;;  %v1977_v46 = vrot.slane %v2692_v45, %v1976_v44  ;;  %v2151_v33 = vrot.slane %v96_v49, %v966_v63  ;;  %s2201_s19 = sshll.u32 %s2848_s5, 4  ;;  %s2202_s19 = int_to_ptr.vmem [resolvable:$true] %s2201_s19 }
 0xf13   :  { %2499 = vmatprep.mubr.msk.bf16.mxu1 %vm2844_vm1, %v2843_v6  ;;  %s2803_s20 = scalar_lea.vmem %s2202_s19, 256  ;;  %p2808_p13 = scmp.lt.s32.totalorder %s2202_s19, %s2202_s19 }
 0xf14   :  { %p2804_p12 = scmp.ne.s32.totalorder %s2202_s19, %s2803_s20  ;;  %p2809_p0 = scmp.lt.s32.totalorder %s2803_s20, %s2803_s20 }
 0xf16   :  { %p2810_p1 = por %p2809_p0, %p2808_p13 }
 0xf18   :  { %p2811_p2 = pnand %p2810_p1, %p2804_p12 }
 0xf77   :  { %v1775_v51 = vpop.f32.mrb[48].mxu0 }
 0xf78   :  { %v2467_v52 = vpop.f32.mrb[49].mxu0  ;;  %v1932_v4 = vsel %vm895_vm2, %v1775_v51, 0.0 }
 0xf79   :  { %v1778_v53 = vpop.f32.mrb[50].mxu0 }
 0xf7a   :  { %v2468_v54 = vpop.f32.mrb[51].mxu0  ;;  %v1939_v62 = vsel %vm895_vm2, %v1778_v53, 0.0  ;;  %v1983_v53 = vrot.slane %v96_v49, %v159_v39 }
 0xfdc   :  { %v1825_v55 = vpop.f32.mrb[48].mxu1 }
 0xfdd   :  { %v1933_v56 = vsel %vm895_vm2, %v1825_v55, 0.0  ;;  %v2473_v57 = vpop.f32.mrb[49].mxu1 }
 0xfde   :  { %v1934_v60 = vadd.f32 %v1933_v56, %v1932_v4  ;;  %v1828_v61 = vpop.f32.mrb[50].mxu1 }
 0xfdf   :  { %v1940_v1 = vsel %vm895_vm2, %v1828_v61, 0.0  ;;  %v2474_v2 = vpop.f32.mrb[51].mxu1  ;;  %v2602_v61 = vld [vmem:[#allocation10 + $0x30] sm:$0xff]  }
 0xfe0   :  { %v1941_v3 = vadd.f32 %v1940_v1, %v1939_v62  ;;  %2496 = vmatpush3.bf16.msra.mxu1 %v2602_v61  ;;  %v2603_v62 = vld [vmem:[#allocation10 + $0x38] sm:$0xff]   ;;  %v1995_v1 = vrot.slane %v96_v49, %v949_v48 }
 0xfe1   :  { %v1875_v14 = vpop.f32.mrb[52].mxu0  ;;  %2497 = vmatprep.subr.bf16.mxu1 %v2843_v6 }
 0xfe2   :  { %v1935_v40 = vsel %vm895_vm2, %v1875_v14, 0.0  ;;  %v2479_v5 = vpop.f32.mrb[53].mxu0 }
 0xfe3   :  { %v1936_v0 = vadd.f32 %v1935_v40, %v1934_v60  ;;  %v1878_v7 = vpop.f32.mrb[54].mxu0 }
 0xfe4   :  { %v1942_v9 = vsel %vm895_vm2, %v1878_v7, 0.0  ;;  %v2480_v11 = vpop.f32.mrb[55].mxu0  ;;  %2498 = vmatpush3.bf16.msra.mxu1 %v2603_v62 }
 0xfe5   :  { %v1943_v13 = vadd.f32 %v1942_v9, %v1941_v3  ;;  %v1925_v15 = vpop.f32.mrb[52].mxu1  ;;  %v2063_v11 = vrot.slane %v96_v49, %v955_v50 }
 0xfe6   :  { %v1937_v16 = vsel %vm895_vm2, %v1925_v15, 0.0  ;;  %v2485_v17 = vpop.f32.mrb[53].mxu1 }
 0xfe7   :  { %v1938_v18 = vadd.f32 %v1937_v16, %v1936_v0  ;;  %v1928_v8 = vpop.f32.mrb[54].mxu1 }
 0xfe8   :  { %v1944_v10 = vsel %vm895_vm2, %v1928_v8, 0.0  ;;  %v2486_v19 = vpop.f32.mrb[55].mxu1 }
 0xfe9   :  { %v1945_v20 = vadd.f32 %v1944_v10, %v1943_v13  ;;  %v1946_v21 = vadd.f32 %v1938_v18, %v3153_v58 }
 0xfeb   :  { %v1948_v22 = vsel %vm895_vm2, %v1946_v21, 0.0  ;;  %v1947_v23 = vadd.f32 %v1945_v20, %v3155_v59  ;;  %v2601_v59 = vld [vmem:[#allocation10 + $0x28] sm:$0xff]  }
 0xfec   :  { %1949 = vadd.xlane.f32.xlu1 %v1948_v22  ;;  %2490 = vmatpush3.bf16.msra.mxu0 %v2601_v59 }
 0xfed   :  { %v1951_v24 = vsel %vm895_vm2, %v1947_v23, 0.0 }
 0xfee   :  { %1952 = vadd.xlane.f32.xlu0 %v1951_v24 }
0x1079   :  { %v1950_v25 = vpop.xlane.xlu1 %1949 }
0x107a   :  { %v1954_v26 = vmul.f32 0.03125, %v1950_v25 }
0x107b   :  { %v1953_v27 = vpop.xlane.xlu0 %1952 }
0x107c   :  { %v1956_v28 = vsub.f32 %v1946_v21, %v1954_v26  ;;  %v1955_v29 = vmul.f32 0.03125, %v1953_v27 }
0x107e   :  { %v1957_v30 = vsub.f32 %v1947_v23, %v1955_v29  ;;  %v1958_v31 = vmul.f32 %v1956_v28, %v1956_v28 }
0x1080   :  { %v1960_v32 = vsel %vm895_vm2, %v1958_v31, 0.0  ;;  %v1959_v34 = vmul.f32 %v1957_v30, %v1957_v30 }
0x1081   :  { %1961 = vadd.xlane.f32.xlu0 %v1960_v32 }
0x1082   :  { %v1963_v58 = vsel %vm895_vm2, %v1959_v34, 0.0 }
0x1083   :  { %1964 = vadd.xlane.f32.xlu1 %v1963_v58 }
0x110e   :  { %v1962_v35 = vpop.xlane.xlu0 %1961 }
0x110f   :  { %v1966_v37 = vmul.f32 0.03125, %v1962_v35  ;;  %v2157_v35 = vrot.slane %v96_v49, %v1034_v12 }
0x1110   :  { %v1965_v38 = vpop.xlane.xlu1 %1964 }
0x1111   :  { %v1968_v41 = vadd.f32 1e-05, %v1966_v37  ;;  %v1967_v42 = vmul.f32 0.03125, %v1965_v38 }
0x1113   :  { %2676 = vrsqrt.f32 %v1968_v41  ;;  %v1969_v43 = vadd.f32 1e-05, %v1967_v42 }
0x1115   :  { %2678 = vrsqrt.f32 %v1969_v43 }
0x111d   :  { %v2677_v47 = vpop.eup %2676 }
0x111e   :  { %v1972_v51 = vmul.f32 %v2677_v47, %v1956_v28 }
0x111f   :  { %v2679_v52 = vpop.eup %2678 }
0x1120   :  { %v1978_v54 = vmul.f32 %v1977_v46, %v1972_v51  ;;  %v1973_v55 = vmul.f32 %v2679_v52, %v1957_v30 }
0x1122   :  { %v1979_v4 = vmul.f32 %v1977_v46, %v1973_v55  ;;  %v1984_v56 = vadd.f32 %v1983_v53, %v1978_v54 }
0x1124   :  { %v1985_v57 = vadd.f32 %v1983_v53, %v1979_v4 }
0x1126   :  { %v1986_v60 = vpack.c.bf16 %v1985_v57, %v1984_v56 }
0x1128   :  { %2492 = vmatmul.mubr.msk.bf16.vlgmr.msra.gmra.mrb[56].mxu0 %vm895_vm2, %v1986_v60 }
0x11fb   :  { %v2045_v2 = vpop.f32.mrb[56].mxu0 }
0x11fc   :  { %v2046_v3 = vadd.f32 %v2045_v2, %v1995_v1  ;;  %v2493_v39 = vpop.f32.mrb[57].mxu0 }
0x11fd   :  { %v2048_v14 = vpop.f32.mrb[58].mxu0 }
0x11fe   :  { %v2049_v40 = vadd.f32 %v2048_v14, %v1995_v1  ;;  %v2494_v5 = vpop.f32.mrb[59].mxu0  ;;  %v2052_v0 = vmax.f32 %v2046_v3, 0.0 }
0x1200   :  { %v2053_v7 = vmax.f32 %v2049_v40, 0.0 }
0x1202   :  { %v2054_v9 = vpack.c.bf16 %v2053_v7, %v2052_v0 }
0x1204   :  { %2500 = vmatmul.mubr.msk.bf16.vlgmr.msra.gmra.mrb[56].mxu1 %vm895_vm2, %v2054_v9 }
0x12d7   :  { %v2113_v6 = vpop.f32.mrb[56].mxu1 }
0x12d8   :  { %v2114_v13 = vadd.f32 %v2113_v6, %v2063_v11  ;;  %v2501_v15 = vpop.f32.mrb[57].mxu1 }
0x12d9   :  { %v2116_v16 = vpop.f32.mrb[58].mxu1 }
0x12da   :  { %v2117_v17 = vadd.f32 %v2116_v16, %v2063_v11  ;;  %v2502_v48 = vpop.f32.mrb[59].mxu1  ;;  %v2120_v18 = vadd.f32 %v2114_v13, %v1984_v56 }
0x12dc   :  { %v2122_v8 = vsel %vm895_vm2, %v2120_v18, 0.0  ;;  %v2121_v10 = vadd.f32 %v2117_v17, %v1985_v57 }
0x12dd   :  { %2123 = vadd.xlane.f32.xlu0 %v2122_v8 }
0x12de   :  { %v2125_v19 = vsel %vm895_vm2, %v2121_v10, 0.0 }
0x12df   :  { %2126 = vadd.xlane.f32.xlu1 %v2125_v19 }
0x136a   :  { %v2124_v20 = vpop.xlane.xlu0 %2123 }
0x136b   :  { %v2128_v21 = vmul.f32 0.03125, %v2124_v20 }
0x136c   :  { %v2127_v22 = vpop.xlane.xlu1 %2126 }
0x136d   :  { %v2130_v23 = vsub.f32 %v2120_v18, %v2128_v21  ;;  %v2129_v24 = vmul.f32 0.03125, %v2127_v22 }
0x136f   :  { %v2131_v50 = vsub.f32 %v2121_v10, %v2129_v24  ;;  %v2132_v25 = vmul.f32 %v2130_v23, %v2130_v23 }
0x1371   :  { %v2134_v26 = vsel %vm895_vm2, %v2132_v25, 0.0  ;;  %v2133_v27 = vmul.f32 %v2131_v50, %v2131_v50 }
0x1372   :  { %2135 = vadd.xlane.f32.xlu0 %v2134_v26 }
0x1373   :  { %v2137_v28 = vsel %vm895_vm2, %v2133_v27, 0.0 }
0x1374   :  { %2138 = vadd.xlane.f32.xlu1 %v2137_v28 }
0x13ff   :  { %v2136_v29 = vpop.xlane.xlu0 %2135 }
0x1400   :  { %v2140_v30 = vmul.f32 0.03125, %v2136_v29 }
0x1401   :  { %v2139_v31 = vpop.xlane.xlu1 %2138 }
0x1402   :  { %v2142_v32 = vadd.f32 1e-05, %v2140_v30  ;;  %v2141_v34 = vmul.f32 0.03125, %v2139_v31 }
0x1404   :  { %2680 = vrsqrt.f32 %v2142_v32  ;;  %v2143_v58 = vadd.f32 1e-05, %v2141_v34 }
0x1406   :  { %2682 = vrsqrt.f32 %v2143_v58 }
0x140e   :  { %v2681_v59 = vpop.eup %2680 }
0x140f   :  { %v2146_v37 = vmul.f32 %v2681_v59, %v2130_v23 }
0x1410   :  { %v2683_v38 = vpop.eup %2682 }
0x1411   :  { %v2152_v41 = vmul.f32 %v2151_v33, %v2146_v37  ;;  %v2147_v42 = vmul.f32 %v2683_v38, %v2131_v50 }
0x1413   :  { %v2153_v43 = vmul.f32 %v2151_v33, %v2147_v42  ;;  %v2158_v44 = vadd.f32 %v2157_v35, %v2152_v41 }
0x1415   :  { %v2159_v45 = vadd.f32 %v2157_v35, %v2153_v43  ;;  %v2160_v46 = vand.u32 2147483647, %v2158_v44  ;;  %v2186_v39 = vmax.f32 %v2158_v44, 0.0  ;;  %vm2190_vm5 = vcmp.gt.f32.partialorder %v2158_v44, 20.0 }
0x1417   :  { %v2161_v47 = vand.u32 2147483647, %v2159_v45  ;;  %v2162_v51 = vsub.f32 0.0, %v2160_v46  ;;  %v2187_v0 = vmax.f32 %v2159_v45, 0.0  ;;  %vm2191_vm6 = vcmp.gt.f32.partialorder %v2159_v45, 20.0 }
0x1419   :  { %v2163_v52 = vsub.f32 0.0, %v2161_v47  ;;  %v2164_v53 = vmul.f32 1.442695, %v2162_v51 }
0x141b   :  { %2684 = vpow2.f32 %v2164_v53  ;;  %v2166_v54 = vmul.f32 1.442695, %v2163_v52 }
0x141d   :  { %2686 = vpow2.f32 %v2166_v54 }
0x1425   :  { %v2685_v63 = vpop.eup %2684 }
0x1426   :  { %v2168_v55 = vadd.f32 1.0, %v2685_v63  ;;  %v2171_v12 = vmul.f32 -0.5, %v2685_v63  ;;  %v2174_v57 = vand.u32 2147483647, %v2685_v63 }
0x1427   :  { %v2687_v4 = vpop.eup %2686 }
0x1428   :  { %2688 = vlog2.f32 %v2168_v55  ;;  %v2177_v36 = vadd.f32 1.0, %v2687_v4  ;;  %v2180_v49 = vmul.f32 -0.5, %v2687_v4  ;;  %v2172_v56 = vadd.f32 1.0, %v2171_v12 }
0x1429   :  { %v2183_v62 = vand.u32 2147483647, %v2687_v4  ;;  %vm2175_vm3 = vcmp.lt.f32.partialorder %v2174_v57, 0.0004427343 }
0x142a   :  { %2690 = vlog2.f32 %v2177_v36  ;;  %v2181_v60 = vadd.f32 1.0, %v2180_v49  ;;  %v2173_v2 = vmul.f32 %v2685_v63, %v2172_v56 }
0x142b   :  { %vm2184_vm4 = vcmp.lt.f32.partialorder %v2183_v62, 0.0004427343 }
0x142c   :  { %v2182_v5 = vmul.f32 %v2687_v4, %v2181_v60 }
0x1432   :  { %v2689_v61 = vpop.eup %2688 }
0x1433   :  { %v2170_v1 = vmul.f32 0.6931472, %v2689_v61 }
0x1434   :  { %v2691_v3 = vpop.eup %2690 }
0x1435   :  { %v2176_v14 = vsel %vm2175_vm3, %v2173_v2, %v2170_v1  ;;  %v2179_v40 = vmul.f32 0.6931472, %v2691_v3 }
0x1436   :  { %v2188_v7 = vadd.f32 %v2186_v39, %v2176_v14 }
0x1437   :  { %v2185_v9 = vsel %vm2184_vm4, %v2182_v5, %v2179_v40 }
0x1438   :  { %v2189_v11 = vadd.f32 %v2187_v0, %v2185_v9  ;;  %v2192_v6 = vsel %vm2190_vm5, %v2158_v44, %v2188_v7 }
0x1439   :  { %2194 = vst.msk [vmem:[#allocation11] sm:$0xff] %vm895_vm2, %v2192_v6 }
0x143a   :  { %v2193_v13 = vsel %vm2191_vm6, %v2159_v45, %v2189_v11 }
0x143b   :  { %2195 = vst.msk [vmem:[#allocation11 + $0x8] sm:$0xff] %vm895_vm2, %v2193_v13 }
0x143c   :  { %2814 = shalt.err (!%p2811_p2)
}
0x143d   :  { %s2815_s0 = scalar_lea.hbm %s3311_s6, 256 }
0x143e   :  { %p2816_p3 = scmp.ne.s32.totalorder %s3311_s6, %s2815_s0  ;;  %p2819_p4 = scmp.lt.u32.totalorder %s2815_s0, %s3311_s6 }
0x1440   :  { %p2821_p5 = pnand %p2819_p4, %p2816_p3 }
0x1442   :  { %2824 = shalt.err (!%p2821_p5)
}
0x1443   :  { %2207 = dma.vmem_to_hbm [thread:$0]  %s2202_s19, 256, %s3311_s6, [#allocation4], %s2835_s9, %s2835_s9, %s2836_s10  }
0x1444   :  { %2831 = dma.done.wait [#allocation4], 256  }
0x1445   :  { %2832 = vsyncadd [#allocation4], 4294967040 }
0x1446   :  { %2211 = vsyncpa [#allocation3], 1 }
0x1447   :  { %2212 = vsyncpa [#allocation6], 1 }
0x1448   :  { %2213 = vsyncpa [#allocation9], 1 }
0x1449   :  { %2214 = vsyncpa [#allocation4], 1 }

</bundles_post_ra>
